<compile_context>
chip_gen: v7x
topology: tpu7x:2x2x1
jax: 0.10.0
libtpu: 0.0.40
codegen_flags: <defaults>
</compile_context>

<pallas_src>
import functools

import jax
import jax.numpy as jnp
import numpy as np
from jax.experimental import pallas as pl
from jax.experimental.pallas import tpu as pltpu

# ------------------------- "cfg" for this synthetic module ------------------
N_BATCH = 2
CHAN = 4          # cfg.featuremap_out_channel
HEIGHT = 16       # cfg.img_height // cfg.featuremap_out_stride
WIDTH = 16        # cfg.img_width  // cfg.featuremap_out_stride
CONV_STRIDE = 5   # conv kernel length K (padding = K // 2)
N_ITER = 2        # iter
ALPHA = 2.0       # alpha
DIRECTIONS = ("d", "u", "r", "l")   # cfg.aggregator.direction
PAD = CONV_STRIDE // 2


# ----------------------- static circular index shifts ------------------------
def _shift_rows(z, k):
    """out[i, :] = z[(i + k) % R, :]  (static k; slices at multiples of 8)."""
    r = z.shape[0]
    k = k % r
    if k == 0:
        return z
    return jnp.concatenate([z[k:, :], z[:k, :]], axis=0)


def _shift_cols(z, k):
    """out[:, j] = z[:, (j + k) % C]  (static k; lane-axis slice + concat)."""
    c = z.shape[1]
    k = k % c
    if k == 0:
        return z
    return jnp.concatenate([z[:, k:], z[:, :k]], axis=1)


# ------------------------------- Pallas kernel -------------------------------
def _resa_kernel(x_ref, m_ref, l_ref, out_ref, *, row_shifts, col_shifts,
                 n_chan, width):
    """Entire RESA forward.  One MXU matmul per RESA step; gathers are static
    circular shifts; the d/u -> r/l layout switch is slice + stack (no matmul).

    x_ref   : (H*N, C*W)            layout A: rows=(h,n), cols=(c,w)
    m_ref   : (n_du, C*W, C*W)      fused (1,K)-conv + channel-mix, alpha folded
    l_ref   : (n_rl, C*H*N, C*H*N)  fused (K,1)-conv + channel-mix, alpha folded
    out_ref : (C*H*N, W)            layout B: rows=(c,h,n), cols=w
    """
    f32 = jnp.float32
    x_a = x_ref[...]                                             # (H*N, C*W)

    # ---- d/u group: one MXU matmul + one row shift per step -----------------
    for j, k in enumerate(row_shifts):
        z = jnp.maximum(jnp.dot(x_a, m_ref[j], preferred_element_type=f32), 0.0)
        x_a = x_a + _shift_rows(z, k)

    # ---- layout switch A -> B: stack per-channel column blocks as row blocks.
    # Columns are already ordered (c, w), so each plane is a contiguous slice.
    planes = [x_a[:, c * width:(c + 1) * width] for c in range(n_chan)]
    x_b = jnp.concatenate(planes, axis=0)                        # (C*H*N, W)

    # ---- r/l group: one MXU matmul + one column shift per step --------------
    for j, k in enumerate(col_shifts):
        z = jnp.maximum(jnp.dot(l_ref[j], x_b, preferred_element_type=f32), 0.0)
        x_b = x_b + _shift_cols(z, k)

    out_ref[...] = x_b.astype(out_ref.dtype)


# --------------------------- Operator construction ---------------------------
def _build_operators(weights, *, N, C, H, W, K, n_iter, alpha, directions):
    """Fold conv weights, zero padding, channel mixing and alpha into dense
    per-step operators; return static shift amounts for the circular gathers.
    Host-side, one-time (hoisted out of the per-call path)."""
    pad = K // 2
    steps = [(d, i) for d in directions for i in range(n_iter)]
    du = [(idx, d, i) for idx, (d, i) in enumerate(steps) if d in ("d", "u")]
    rl = [(idx, d, i) for idx, (d, i) in enumerate(steps) if d in ("r", "l")]
    # Kernel runs all d/u steps, then all r/l steps: require that global order.
    assert [idx for idx, _, _ in du] == list(range(len(du))), \
        "direction order must list all d/u steps before all r/l steps"
    # Folding alpha inside the relu operand requires alpha >= 0.
    assert alpha >= 0.0

    # Banded structure tensors of the zero-padded 1-D convolutions.
    S_w = np.zeros((K, W, W), np.float32)       # S_w[k, wi, wo] = 1 iff wi = wo + k - pad
    for k in range(K):
        for wo in range(W):
            wi = wo + k - pad
            if 0 <= wi < W:
                S_w[k, wi, wo] = 1.0
    S_h = np.zeros((K, H, H), np.float32)       # S_h[k, ho, hi] = 1 iff hi = ho + k - pad
    for k in range(K):
        for ho in range(H):
            hi = ho + k - pad
            if 0 <= hi < H:
                S_h[k, hi * 0 + ho, hi] = 0.0   # placeholder (overwritten below)
    S_h[...] = 0.0
    for k in range(K):
        for ho in range(H):
            hi = ho + k - pad
            if 0 <= hi < H:
                S_h[k, ho, hi] = 1.0
    eye_n = np.eye(N, dtype=np.float32)

    Ms, row_shifts = [], []
    for idx, d, i in du:
        w_kio = np.asarray(weights[idx], np.float32)            # (K, Cin, Cout)
        # M[(ci,wi),(co,wo)] = alpha * w[wi-wo+pad, ci, co]  (0 outside the band)
        M4 = alpha * np.einsum("kvw,kio->ivow", S_w, w_kio)     # (Ci, Wi, Co, Wo)
        Ms.append(M4.reshape(C * W, C * W))
        s = H // (2 ** (n_iter - i))
        row_shifts.append((+1 if d == "d" else -1) * s * N)     # rows = (h, n)

    Ls, col_shifts = [], []
    for idx, d, i in rl:
        w_kio = np.asarray(weights[idx], np.float32)
        # L_core[(co,ho),(ci,hi)] = alpha * w[hi-ho+pad, ci, co]
        L4 = alpha * np.einsum("kgh,kio->ogih", S_h, w_kio)     # (Co, Ho, Ci, Hi)
        # Block-diagonal over the batch factor (rows/cols ordered (c, h, n)).
        # TODO(synk): at production sizes drop this N-kron (batch via grid axis).
        L6 = np.einsum("ogih,mn->ogmihn", L4, eye_n)            # (Co,Ho,N, Ci,Hi,N)
        Ls.append(L6.reshape(C * H * N, C * H * N))
        s = W // (2 ** (n_iter - i))
        col_shifts.append((+1 if d == "r" else -1) * s)

    return (jnp.asarray(np.stack(Ms)), jnp.asarray(np.stack(Ls)),
            tuple(row_shifts), tuple(col_shifts))


# --------------------------------- Wrapper -----------------------------------
def build_resa_forward(weights, *, N, C, H, W, K, n_iter, alpha, directions):
    """Build operators once; return a jitted forward(x_nchw) -> (N,C,H,W)."""
    M, L, row_shifts, col_shifts = _build_operators(
        weights, N=N, C=C, H=H, W=W, K=K, n_iter=n_iter, alpha=alpha,
        directions=directions)

    kernel = functools.partial(_resa_kernel, row_shifts=row_shifts,
                               col_shifts=col_shifts, n_chan=C, width=W)
    call = pl.pallas_call(
        kernel,
        out_shape=jax.ShapeDtypeStruct((C * H * N, W), jnp.float32),
        in_specs=[pl.BlockSpec(memory_space=pltpu.MemorySpace.VMEM)] * 3,
        out_specs=pl.BlockSpec(memory_space=pltpu.MemorySpace.VMEM),
    )

    @jax.jit
    def forward(x_nchw):
        # Layout plumbing (pure XLA, outside the kernel):
        #   NCHW -> (H*N, C*W) slab, rows=(h,n), cols=(c,w).
        x_a = jnp.transpose(x_nchw, (2, 0, 1, 3)).reshape(H * N, C * W)
        out_b = call(x_a, M, L)
        # Output layout B rows=(c,h,n), cols=w -> untranspose to NCHW.
        return jnp.transpose(out_b.reshape(C, H, N, W), (2, 0, 1, 3))

    return forward


# -------------------------- Pure-JAX reference (NCHW) ------------------------
def resa_reference(x, weights):
    pad = CONV_STRIDE // 2
    step = 0
    for direction in DIRECTIONS:
        for i in range(N_ITER):
            w_kcc = weights[step]
            step += 1
            w_oik = jnp.transpose(w_kcc, (2, 1, 0))   # (Cout, Cin, K)
            if direction in ("d", "u"):
                H = x.shape[2]
                s = H // (2 ** (N_ITER - i))
                sgn = 1 if direction == "d" else -1
                idx = (jnp.arange(H) + sgn * s) % H
                g = x[:, :, idx, :]
                y = jax.lax.conv_general_dilated(
                    g, w_oik[:, :, None, :], (1, 1), ((0, 0), (pad, pad)),
                    dimension_numbers=("NCHW", "OIHW", "NCHW"))
            else:
                W = x.shape[3]
                s = W // (2 ** (N_ITER - i))
                sgn = 1 if direction == "r" else -1
                idx = (jnp.arange(W) + sgn * s) % W
                g = x[:, :, :, idx]
                y = jax.lax.conv_general_dilated(
                    g, w_oik[:, :, :, None], (1, 1), ((pad, pad), (0, 0)),
                    dimension_numbers=("NCHW", "OIHW", "NCHW"))
            x = x + ALPHA * jax.nn.relu(y)
    return x


# ----------------------------------- Main ------------------------------------
if __name__ == "__main__":
    key = jax.random.PRNGKey(0)
    kx, kw = jax.random.split(key)
    x = jax.random.normal(kx, (N_BATCH, CHAN, HEIGHT, WIDTH), jnp.float32)

    # Deterministic synthetic conv weights, one per (direction, iter) step,
    # stored as (K, Cin, Cout) == torch weight (Cout, Cin, 1, K)/(Cout, Cin, K, 1)
    # with the tap axis first.
    wkeys = jax.random.split(kw, len(DIRECTIONS) * N_ITER)
    weights = [0.05 * jax.random.normal(k, (CONV_STRIDE, CHAN, CHAN), jnp.float32)
               for k in wkeys]

    forward = build_resa_forward(weights, N=N_BATCH, C=CHAN, H=HEIGHT, W=WIDTH,
                                 K=CONV_STRIDE, n_iter=N_ITER, alpha=ALPHA,
                                 directions=DIRECTIONS)
    out = jax.block_until_ready(forward(x))

    ref = resa_reference(x, weights)
    assert out.shape == x.shape and out.dtype == x.dtype
    np.testing.assert_allclose(np.asarray(out), np.asarray(ref),
                               rtol=1e-4, atol=1e-4)
    print("KERNEL_OK")
</pallas_src>

<mosaic_0001>
module attributes {stable_mosaic.version = 11 : i64} {
  func.func @_resa_kernel(%arg0: memref<32x64xf32, #tpu.memory_space<vmem>>, %arg1: memref<4x64x64xf32, #tpu.memory_space<vmem>>, %arg2: memref<4x128x128xf32, #tpu.memory_space<vmem>>, %arg3: memref<128x16xf32, #tpu.memory_space<vmem>>) attributes {dimension_semantics = [], scalar_prefetch = 0 : i64, scratch_operands = 0 : i64, tpu.core_type = #tpu.core_type<tc>} {
    %c0 = arith.constant 0 : index
    %c0_0 = arith.constant 0 : index
    %0 = vector.load %arg0[%c0, %c0_0] : memref<32x64xf32, #tpu.memory_space<vmem>>, vector<32x64xf32>
    %c0_1 = arith.constant 0 : index
    %c0_2 = arith.constant 0 : index
    %c0_3 = arith.constant 0 : index
    %1 = vector.load %arg1[%c0_1, %c0_2, %c0_3] : memref<4x64x64xf32, #tpu.memory_space<vmem>>, vector<1x64x64xf32>
    %2 = vector.shape_cast %1 : vector<1x64x64xf32> to vector<64x64xf32>
    %cst = arith.constant dense<0.000000e+00> : vector<32x64xf32>
    %3 = tpu.matmul %0, %2, %cst {dimension_numbers = #tpu.dot_dimension_numbers<[1], [0], [0], [1], [0, 0, 1, 1], [], []>} : vector<32x64xf32>, vector<64x64xf32>, vector<32x64xf32> -> vector<32x64xf32>
    %cst_4 = arith.constant 0.000000e+00 : f32
    %4 = vector.broadcast %cst_4 : f32 to vector<32x64xf32>
    %5 = arith.maximumf %3, %4 : vector<32x64xf32>
    %6 = vector.extract_strided_slice %5 {offsets = [8, 0], sizes = [24, 64], strides = [1, 1]} : vector<32x64xf32> to vector<24x64xf32>
    %7 = vector.extract_strided_slice %5 {offsets = [0, 0], sizes = [8, 64], strides = [1, 1]} : vector<32x64xf32> to vector<8x64xf32>
    %8 = tpu.concatenate %6, %7 in 0 : vector<24x64xf32>, vector<8x64xf32> -> vector<32x64xf32>
    %9 = arith.addf %0, %8 : vector<32x64xf32>
    %c1 = arith.constant 1 : index
    %c0_5 = arith.constant 0 : index
    %c0_6 = arith.constant 0 : index
    %10 = vector.load %arg1[%c1, %c0_5, %c0_6] : memref<4x64x64xf32, #tpu.memory_space<vmem>>, vector<1x64x64xf32>
    %11 = vector.shape_cast %10 : vector<1x64x64xf32> to vector<64x64xf32>
    %cst_7 = arith.constant dense<0.000000e+00> : vector<32x64xf32>
    %12 = tpu.matmul %9, %11, %cst_7 {dimension_numbers = #tpu.dot_dimension_numbers<[1], [0], [0], [1], [0, 0, 1, 1], [], []>} : vector<32x64xf32>, vector<64x64xf32>, vector<32x64xf32> -> vector<32x64xf32>
    %cst_8 = arith.constant 0.000000e+00 : f32
    %13 = vector.broadcast %cst_8 : f32 to vector<32x64xf32>
    %14 = arith.maximumf %12, %13 : vector<32x64xf32>
    %15 = vector.extract_strided_slice %14 {offsets = [16, 0], sizes = [16, 64], strides = [1, 1]} : vector<32x64xf32> to vector<16x64xf32>
    %16 = vector.extract_strided_slice %14 {offsets = [0, 0], sizes = [16, 64], strides = [1, 1]} : vector<32x64xf32> to vector<16x64xf32>
    %17 = tpu.concatenate %15, %16 in 0 : vector<16x64xf32>, vector<16x64xf32> -> vector<32x64xf32>
    %18 = arith.addf %9, %17 : vector<32x64xf32>
    %c2 = arith.constant 2 : index
    %c0_9 = arith.constant 0 : index
    %c0_10 = arith.constant 0 : index
    %19 = vector.load %arg1[%c2, %c0_9, %c0_10] : memref<4x64x64xf32, #tpu.memory_space<vmem>>, vector<1x64x64xf32>
    %20 = vector.shape_cast %19 : vector<1x64x64xf32> to vector<64x64xf32>
    %cst_11 = arith.constant dense<0.000000e+00> : vector<32x64xf32>
    %21 = tpu.matmul %18, %20, %cst_11 {dimension_numbers = #tpu.dot_dimension_numbers<[1], [0], [0], [1], [0, 0, 1, 1], [], []>} : vector<32x64xf32>, vector<64x64xf32>, vector<32x64xf32> -> vector<32x64xf32>
    %cst_12 = arith.constant 0.000000e+00 : f32
    %22 = vector.broadcast %cst_12 : f32 to vector<32x64xf32>
    %23 = arith.maximumf %21, %22 : vector<32x64xf32>
    %24 = vector.extract_strided_slice %23 {offsets = [24, 0], sizes = [8, 64], strides = [1, 1]} : vector<32x64xf32> to vector<8x64xf32>
    %25 = vector.extract_strided_slice %23 {offsets = [0, 0], sizes = [24, 64], strides = [1, 1]} : vector<32x64xf32> to vector<24x64xf32>
    %26 = tpu.concatenate %24, %25 in 0 : vector<8x64xf32>, vector<24x64xf32> -> vector<32x64xf32>
    %27 = arith.addf %18, %26 : vector<32x64xf32>
    %c3 = arith.constant 3 : index
    %c0_13 = arith.constant 0 : index
    %c0_14 = arith.constant 0 : index
    %28 = vector.load %arg1[%c3, %c0_13, %c0_14] : memref<4x64x64xf32, #tpu.memory_space<vmem>>, vector<1x64x64xf32>
    %29 = vector.shape_cast %28 : vector<1x64x64xf32> to vector<64x64xf32>
    %cst_15 = arith.constant dense<0.000000e+00> : vector<32x64xf32>
    %30 = tpu.matmul %27, %29, %cst_15 {dimension_numbers = #tpu.dot_dimension_numbers<[1], [0], [0], [1], [0, 0, 1, 1], [], []>} : vector<32x64xf32>, vector<64x64xf32>, vector<32x64xf32> -> vector<32x64xf32>
    %cst_16 = arith.constant 0.000000e+00 : f32
    %31 = vector.broadcast %cst_16 : f32 to vector<32x64xf32>
    %32 = arith.maximumf %30, %31 : vector<32x64xf32>
    %33 = vector.extract_strided_slice %32 {offsets = [16, 0], sizes = [16, 64], strides = [1, 1]} : vector<32x64xf32> to vector<16x64xf32>
    %34 = vector.extract_strided_slice %32 {offsets = [0, 0], sizes = [16, 64], strides = [1, 1]} : vector<32x64xf32> to vector<16x64xf32>
    %35 = tpu.concatenate %33, %34 in 0 : vector<16x64xf32>, vector<16x64xf32> -> vector<32x64xf32>
    %36 = arith.addf %27, %35 : vector<32x64xf32>
    %37 = vector.extract_strided_slice %36 {offsets = [0, 0], sizes = [32, 16], strides = [1, 1]} : vector<32x64xf32> to vector<32x16xf32>
    %38 = vector.extract_strided_slice %36 {offsets = [0, 16], sizes = [32, 16], strides = [1, 1]} : vector<32x64xf32> to vector<32x16xf32>
    %39 = vector.extract_strided_slice %36 {offsets = [0, 32], sizes = [32, 16], strides = [1, 1]} : vector<32x64xf32> to vector<32x16xf32>
    %40 = vector.extract_strided_slice %36 {offsets = [0, 48], sizes = [32, 16], strides = [1, 1]} : vector<32x64xf32> to vector<32x16xf32>
    %41 = tpu.concatenate %37, %38, %39, %40 in 0 : vector<32x16xf32>, vector<32x16xf32>, vector<32x16xf32>, vector<32x16xf32> -> vector<128x16xf32>
    %c0_17 = arith.constant 0 : index
    %c0_18 = arith.constant 0 : index
    %c0_19 = arith.constant 0 : index
    %42 = vector.load %arg2[%c0_17, %c0_18, %c0_19] : memref<4x128x128xf32, #tpu.memory_space<vmem>>, vector<1x128x128xf32>
    %43 = vector.shape_cast %42 : vector<1x128x128xf32> to vector<128x128xf32>
    %cst_20 = arith.constant dense<0.000000e+00> : vector<128x16xf32>
    %44 = tpu.matmul %43, %41, %cst_20 {dimension_numbers = #tpu.dot_dimension_numbers<[1], [0], [0], [1], [0, 0, 1, 1], [], []>} : vector<128x128xf32>, vector<128x16xf32>, vector<128x16xf32> -> vector<128x16xf32>
    %cst_21 = arith.constant 0.000000e+00 : f32
    %45 = vector.broadcast %cst_21 : f32 to vector<128x16xf32>
    %46 = arith.maximumf %44, %45 : vector<128x16xf32>
    %47 = vector.extract_strided_slice %46 {offsets = [0, 4], sizes = [128, 12], strides = [1, 1]} : vector<128x16xf32> to vector<128x12xf32>
    %48 = vector.extract_strided_slice %46 {offsets = [0, 0], sizes = [128, 4], strides = [1, 1]} : vector<128x16xf32> to vector<128x4xf32>
    %49 = tpu.concatenate %47, %48 in 1 : vector<128x12xf32>, vector<128x4xf32> -> vector<128x16xf32>
    %50 = arith.addf %41, %49 : vector<128x16xf32>
    %c1_22 = arith.constant 1 : index
    %c0_23 = arith.constant 0 : index
    %c0_24 = arith.constant 0 : index
    %51 = vector.load %arg2[%c1_22, %c0_23, %c0_24] : memref<4x128x128xf32, #tpu.memory_space<vmem>>, vector<1x128x128xf32>
    %52 = vector.shape_cast %51 : vector<1x128x128xf32> to vector<128x128xf32>
    %cst_25 = arith.constant dense<0.000000e+00> : vector<128x16xf32>
    %53 = tpu.matmul %52, %50, %cst_25 {dimension_numbers = #tpu.dot_dimension_numbers<[1], [0], [0], [1], [0, 0, 1, 1], [], []>} : vector<128x128xf32>, vector<128x16xf32>, vector<128x16xf32> -> vector<128x16xf32>
    %cst_26 = arith.constant 0.000000e+00 : f32
    %54 = vector.broadcast %cst_26 : f32 to vector<128x16xf32>
    %55 = arith.maximumf %53, %54 : vector<128x16xf32>
    %56 = vector.extract_strided_slice %55 {offsets = [0, 8], sizes = [128, 8], strides = [1, 1]} : vector<128x16xf32> to vector<128x8xf32>
    %57 = vector.extract_strided_slice %55 {offsets = [0, 0], sizes = [128, 8], strides = [1, 1]} : vector<128x16xf32> to vector<128x8xf32>
    %58 = tpu.concatenate %56, %57 in 1 : vector<128x8xf32>, vector<128x8xf32> -> vector<128x16xf32>
    %59 = arith.addf %50, %58 : vector<128x16xf32>
    %c2_27 = arith.constant 2 : index
    %c0_28 = arith.constant 0 : index
    %c0_29 = arith.constant 0 : index
    %60 = vector.load %arg2[%c2_27, %c0_28, %c0_29] : memref<4x128x128xf32, #tpu.memory_space<vmem>>, vector<1x128x128xf32>
    %61 = vector.shape_cast %60 : vector<1x128x128xf32> to vector<128x128xf32>
    %cst_30 = arith.constant dense<0.000000e+00> : vector<128x16xf32>
    %62 = tpu.matmul %61, %59, %cst_30 {dimension_numbers = #tpu.dot_dimension_numbers<[1], [0], [0], [1], [0, 0, 1, 1], [], []>} : vector<128x128xf32>, vector<128x16xf32>, vector<128x16xf32> -> vector<128x16xf32>
    %cst_31 = arith.constant 0.000000e+00 : f32
    %63 = vector.broadcast %cst_31 : f32 to vector<128x16xf32>
    %64 = arith.maximumf %62, %63 : vector<128x16xf32>
    %65 = vector.extract_strided_slice %64 {offsets = [0, 12], sizes = [128, 4], strides = [1, 1]} : vector<128x16xf32> to vector<128x4xf32>
    %66 = vector.extract_strided_slice %64 {offsets = [0, 0], sizes = [128, 12], strides = [1, 1]} : vector<128x16xf32> to vector<128x12xf32>
    %67 = tpu.concatenate %65, %66 in 1 : vector<128x4xf32>, vector<128x12xf32> -> vector<128x16xf32>
    %68 = arith.addf %59, %67 : vector<128x16xf32>
    %c3_32 = arith.constant 3 : index
    %c0_33 = arith.constant 0 : index
    %c0_34 = arith.constant 0 : index
    %69 = vector.load %arg2[%c3_32, %c0_33, %c0_34] : memref<4x128x128xf32, #tpu.memory_space<vmem>>, vector<1x128x128xf32>
    %70 = vector.shape_cast %69 : vector<1x128x128xf32> to vector<128x128xf32>
    %cst_35 = arith.constant dense<0.000000e+00> : vector<128x16xf32>
    %71 = tpu.matmul %70, %68, %cst_35 {dimension_numbers = #tpu.dot_dimension_numbers<[1], [0], [0], [1], [0, 0, 1, 1], [], []>} : vector<128x128xf32>, vector<128x16xf32>, vector<128x16xf32> -> vector<128x16xf32>
    %cst_36 = arith.constant 0.000000e+00 : f32
    %72 = vector.broadcast %cst_36 : f32 to vector<128x16xf32>
    %73 = arith.maximumf %71, %72 : vector<128x16xf32>
    %74 = vector.extract_strided_slice %73 {offsets = [0, 8], sizes = [128, 8], strides = [1, 1]} : vector<128x16xf32> to vector<128x8xf32>
    %75 = vector.extract_strided_slice %73 {offsets = [0, 0], sizes = [128, 8], strides = [1, 1]} : vector<128x16xf32> to vector<128x8xf32>
    %76 = tpu.concatenate %74, %75 in 1 : vector<128x8xf32>, vector<128x8xf32> -> vector<128x16xf32>
    %77 = arith.addf %68, %76 : vector<128x16xf32>
    %c0_37 = arith.constant 0 : index
    %c0_38 = arith.constant 0 : index
    %78 = vector.load %arg3[%c0_37, %c0_38] : memref<128x16xf32, #tpu.memory_space<vmem>>, vector<128x16xf32>
    tpu.vector_store %arg3[%c0_37, %c0_38], %77 {strides = array<i32>} : memref<128x16xf32, #tpu.memory_space<vmem>>, vector<128x16xf32>,
    return
  }
}

</mosaic_0001>

<bundles_post_ra>
// kernel: forward.1
= control target key start
LH: loop header
LB: loop body
LE: loop exit
PB: predicated region body
PF: predicated region fallthrough
CT: control target
= control target key end

     0   :  { %8 = vsyncpa [#allocation3], 0  ;;  %s2595_s12 = smov [#allocation2]   ;;  %s3287_s0 = inlined_call_operand.vmem [shape: f32[32,64], index: 0, kind: input, shape index: {}]   ;;  %s3288_s1 = inlined_call_operand.vmem [shape: f32[4,64,64], index: 1, kind: input, shape index: {}]   ;;  %s3289_s2 = inlined_call_operand.hbm [shape: f32[4,128,128], index: 2, kind: input, shape index: {}]   ;;  %s3290_s3 = inlined_call_operand.vmem [shape: f32[128,16], index: 3, kind: output, shape index: {}]  }
   0x1   :  { %s18_s13 = sshll.u32 %s2595_s12, 4  ;;  %s2571_s16 = scalar_lea.hbm %s3289_s2, 8192  ;;  %s19_s13 = int_to_ptr.vmem [resolvable:$true] %s18_s13 }
   0x2   :  { %p2572_p0 = scmp.ne.s32.totalorder %s3289_s2, %s2571_s16  ;;  %p2575_p1 = scmp.lt.u32.totalorder %s2571_s16, %s3289_s2 }
   0x4   :  { %p2577_p2 = pnand %p2575_p1, %p2572_p0 }
   0x6   :  { %2580 = shalt.err (!%p2577_p2)
}
   0x7   :  { %s2581_s21 = scalar_lea.vmem %s19_s13, 8192  ;;  %p2586_p4 = scmp.lt.s32.totalorder %s19_s13, %s19_s13 }
   0x8   :  { %p2582_p3 = scmp.ne.s32.totalorder %s19_s13, %s2581_s21  ;;  %p2587_p5 = scmp.lt.s32.totalorder %s2581_s21, %s2581_s21 }
   0xa   :  { %p2588_p6 = por %p2587_p5, %p2586_p4 }
   0xc   :  { %p2589_p7 = pnand %p2588_p6, %p2582_p3 }
   0xe   :  { %2592 = shalt.err (!%p2589_p7)
}
   0xf   :  { %s2596_s22 = smov 128   ;;  %s2597_s23 = smov 8  }
  0x10   :  { %24 = dma.hbm_to_vmem [thread:$0]  %s3289_s2, 8192, %s19_s13, [#allocation3], %s2596_s22, %s2596_s22, %s2597_s23  }
  0x11   :  { %2593 = dma.done.wait [#allocation3], 8192  }
  0x12   :  { %2594 = vsyncadd [#allocation3], 4294959104  ;;  %v32_v0 = vld [vmem:[%s3288_s1] sm:$0xff]  ;;  %v33_v1 = vld [vmem:[%s3288_s1 + $0x8] sm:$0xff]  ;;  %vm40_vm0 = vcmask 523264   ;;  %s2599_s14 = smov 96  }
  0x13   :  { %v34_v2 = vld [vmem:[%s3288_s1 + $0x10] sm:$0xff]  ;;  %v2368_v3 = vpack.c.bf16 %v33_v1, %v32_v0  ;;  %v35_v4 = vld [vmem:[%s3288_s1 + $0x18] sm:$0xff]  ;;  %v36_v6 = vld [vmem:[%s3288_s1 + $0x20] sm:$0xff]  ;;  %s2600_s15 = smov 80   ;;  %s2601_s16 = smov 124   ;;  %vm817_vm1 = vcmask 97280  }
  0x14   :  { %v2372_v5 = vpack.c.bf16 %v35_v4, %v34_v2  ;;  %v37_v7 = vld [vmem:[%s3288_s1 + $0x28] sm:$0xff]  ;;  %v28_v8 = vld [vmem:[%s3287_s0] sm:$0xff]  ;;  %v1846_v11 = vld [vmem:[%s3288_s1 + $0x50] sm:$0xff]  ;;  %s2602_s17 = smov 12   ;;  %s2603_s18 = smov 120   ;;  %vm1140_vm2 = vcmask 64512  }
  0x15   :  { %2369 = vmatprep.subr.bf16.mxu0 %v2368_v3  ;;  %2072 = vmatprep.mubr.msk.f32.mxu0 %vm40_vm0, %v28_v8  ;;  %v1844_v9 = vld [vmem:[%s3288_s1 + $0x40] sm:$0xff]  ;;  %v1845_v10 = vld [vmem:[%s3288_s1 + $0x48] sm:$0xff]  ;;  %v2376_v12 = vpack.c.bf16 %v37_v7, %v36_v6  ;;  %v1847_v14 = vld [vmem:[%s3288_s1 + $0x58] sm:$0xff]  ;;  %s2604_s19 = smov 116   ;;  %s2605_s20 = smov 4   ;;  %vm1463_vm3 = vcmask 31744  }
  0x16   :  { %2371 = vmatpush3.bf16.msra.mxu0 %v2368_v3  ;;  %v2384_v13 = vpack.c.bf16 %v1845_v10, %v1844_v9  ;;  %v38_v15 = vld [vmem:[%s3288_s1 + $0x30] sm:$0xff]  ;;  %v39_v16 = vld [vmem:[%s3288_s1 + $0x38] sm:$0xff]  ;;  %v2388_v17 = vpack.c.bf16 %v1847_v14, %v1846_v11  ;;  %v29_v19 = vld [vmem:[%s3287_s0 + $0x8] sm:$0xff]  ;;  %vm1818_vm4 = vcmask 130048  }
  0x17   :  { %2373 = vmatprep.subr.bf16.mxu0 %v2372_v5  ;;  %v2380_v18 = vpack.c.bf16 %v39_v16, %v38_v15  ;;  %v30_v20 = vld [vmem:[%s3287_s0 + $0x10] sm:$0xff]  ;;  %v31_v21 = vld [vmem:[%s3287_s0 + $0x18] sm:$0xff]  ;;  %v1848_v22 = vld [vmem:[%s3288_s1 + $0x60] sm:$0xff] }
  0x18   :  { %2385 = vmatprep.subr.bf16.mxu1 %v2384_v13  ;;  %v1849_v23 = vld [vmem:[%s3288_s1 + $0x68] sm:$0xff]  ;;  %v1850_v25 = vld [vmem:[%s3288_s1 + $0x70] sm:$0xff]  ;;  %v1851_v26 = vld [vmem:[%s3288_s1 + $0x78] sm:$0xff] }
  0x19   :  { %2387 = vmatpush3.bf16.msra.mxu1 %v2384_v13  ;;  %v2392_v24 = vpack.c.bf16 %v1849_v23, %v1848_v22  ;;  %v2396_v27 = vpack.c.bf16 %v1851_v26, %v1850_v25  ;;  %v1856_v28 = vld [vmem:[%s3288_s1 + $0x80] sm:$0xff]  ;;  %v1857_v29 = vld [vmem:[%s3288_s1 + $0x88] sm:$0xff]  ;;  %v1858_v30 = vld [vmem:[%s3288_s1 + $0x90] sm:$0xff] }
  0x1a   :  { %2375 = vmatpush3.bf16.msra.mxu0 %v2372_v5  ;;  %2389 = vmatprep.subr.bf16.mxu1 %v2388_v17  ;;  %v2400_v31 = vpack.c.bf16 %v1857_v29, %v1856_v28  ;;  %v1859_v32 = vld [vmem:[%s3288_s1 + $0x98] sm:$0xff]  ;;  %v1860_v46 = vld [vmem:[%s3288_s1 + $0xa0] sm:$0xff]  ;;  %v1861_v47 = vld [vmem:[%s3288_s1 + $0xa8] sm:$0xff] }
  0x1b   :  { %2377 = vmatprep.subr.bf16.mxu0 %v2376_v12  ;;  %v2404_v33 = vpack.c.bf16 %v1859_v32, %v1858_v30  ;;  %v2408_v48 = vpack.c.bf16 %v1861_v47, %v1860_v46  ;;  %v1862_v49 = vld [vmem:[%s3288_s1 + $0xb0] sm:$0xff]  ;;  %v1863_v50 = vld [vmem:[%s3288_s1 + $0xb8] sm:$0xff]  ;;  %v1868_v52 = vld [vmem:[%s3288_s1 + $0xc0] sm:$0xff] }
  0x1c   :  { %v2412_v51 = vpack.c.bf16 %v1863_v50, %v1862_v49  ;;  %v1869_v53 = vld [vmem:[%s3288_s1 + $0xc8] sm:$0xff]  ;;  %v1870_v54 = vld [vmem:[%s3288_s1 + $0xd0] sm:$0xff]  ;;  %v1871_v56 = vld [vmem:[%s3288_s1 + $0xd8] sm:$0xff] }
  0x1d   :  { %2391 = vmatpush3.bf16.msra.mxu1 %v2388_v17  ;;  %v2416_v55 = vpack.c.bf16 %v1869_v53, %v1868_v52  ;;  %v2420_v57 = vpack.c.bf16 %v1871_v56, %v1870_v54  ;;  %v1872_v6 = vld [vmem:[%s3288_s1 + $0xe0] sm:$0xff]  ;;  %v1873_v7 = vld [vmem:[%s3288_s1 + $0xe8] sm:$0xff]  ;;  %v1874_v9 = vld [vmem:[%s3288_s1 + $0xf0] sm:$0xff] }
  0x1e   :  { %2379 = vmatpush3.bf16.msra.mxu0 %v2376_v12  ;;  %2393 = vmatprep.subr.bf16.mxu1 %v2392_v24  ;;  %v1875_v10 = vld [vmem:[%s3288_s1 + $0xf8] sm:$0xff]  ;;  %s2598_s1 = smov 112  }
  0x1f   :  { %2381 = vmatprep.subr.bf16.mxu0 %v2380_v18  ;;  %v2428_v11 = vpack.c.bf16 %v1875_v10, %v1874_v9 }
  0x21   :  { %2395 = vmatpush3.bf16.msra.mxu1 %v2392_v24 }
  0x22   :  { %2383 = vmatpush3.bf16.msra.mxu0 %v2380_v18  ;;  %2397 = vmatprep.subr.bf16.mxu1 %v2396_v27 }
  0x23   :  { %2401 = vmatprep.subr.bf16.mxu0 %v2400_v31 }
  0x25   :  { %2073 = vmatmul.mubr.msk.f32.vlgmr.msra.gmra.mrb[0].mxu0 %vm40_vm0, %v29_v19  ;;  %2399 = vmatpush3.bf16.msra.mxu1 %v2396_v27 }
  0x26   :  { %2075 = vmatprep.mubr.msk.f32.mxu0 %vm40_vm0, %v30_v20  ;;  %2403 = vmatpush3.bf16.msra.mxu0 %v2400_v31 }
  0x27   :  { %2405 = vmatprep.subr.bf16.mxu0 %v2404_v33  ;;  %2417 = vmatprep.subr.bf16.mxu1 %v2416_v55 }
  0x29   :  { %2076 = vmatmul.mubr.msk.f32.gmra.mrb[2].mxu0 %vm40_vm0, %v31_v21 }
  0x2a   :  { %2407 = vmatpush3.bf16.msra.mxu0 %v2404_v33 }
  0x2b   :  { %2409 = vmatprep.subr.bf16.mxu0 %v2408_v48 }
  0x2e   :  { %2411 = vmatpush3.bf16.msra.mxu0 %v2408_v48 }
  0x2f   :  { %2413 = vmatprep.subr.bf16.mxu0 %v2412_v51 }
  0x32   :  { %2415 = vmatpush3.bf16.msra.mxu0 %v2412_v51 }
  0xf8   :  { %v2074_v34 = vpop.f32.mrb[0].mxu0 }
  0xf9   :  { %v139_v35 = vmax.f32 %v2074_v34, 0.0  ;;  %v119_v36 = vpop.f32.mrb[1].mxu0 }
  0xfa   :  { %v138_v42 = vmax.f32 %v119_v36, 0.0 }
  0xfb   :  { %v142_v37 = vadd.f32 %v139_v35, %v28_v8  ;;  %v2424_v8 = vpack.c.bf16 %v1873_v7, %v1872_v6  ;;  %v542_v6 = vld [vmem:[#allocation2 + $0x70] sm:$0xff]  ;;  %v543_v7 = vld [vmem:[#allocation2 + $0x78] sm:$0xff] }
  0xfc   :  { %v2077_v38 = vpop.f32.mrb[2].mxu0  ;;  %v145_v45 = vadd.f32 %v138_v42, %v31_v21 }
  0xfd   :  { %v141_v39 = vmax.f32 %v2077_v38, 0.0  ;;  %v129_v40 = vpop.f32.mrb[3].mxu0  ;;  %2094 = vmatprep.mubr.msk.f32.mxu1 %vm40_vm0, %v142_v37  ;;  %v528_v38 = vld [vmem:[#allocation2] sm:$0xff] }
  0xfe   :  { %v140_v41 = vmax.f32 %v129_v40, 0.0 }
  0xff   :  { %v144_v44 = vadd.f32 %v141_v39, %v30_v20 }
 0x100   :  { %v143_v43 = vadd.f32 %v140_v41, %v29_v19 }
 0x102   :  { %2095 = vmatmul.mubr.msk.f32.vlgmr.msra.gmra.mrb[0].mxu1 %vm40_vm0, %v143_v43 }
 0x103   :  { %2097 = vmatprep.mubr.msk.f32.mxu1 %vm40_vm0, %v144_v44  ;;  %2419 = vmatpush3.bf16.msra.mxu1 %v2416_v55 }
 0x104   :  { %2421 = vmatprep.subr.bf16.mxu1 %v2420_v57 }
 0x106   :  { %2098 = vmatmul.mubr.msk.f32.gmra.mrb[2].mxu1 %vm40_vm0, %v145_v45 }
 0x107   :  { %2423 = vmatpush3.bf16.msra.mxu1 %v2420_v57  ;;  %v529_v57 = vld [vmem:[#allocation2 + $0x8] sm:$0xff] }
 0x108   :  { %2425 = vmatprep.subr.bf16.mxu1 %v2424_v8 }
 0x10b   :  { %2427 = vmatpush3.bf16.msra.mxu1 %v2424_v8 }
 0x10c   :  { %2429 = vmatprep.subr.bf16.mxu1 %v2428_v11 }
 0x10f   :  { %2431 = vmatpush3.bf16.msra.mxu1 %v2428_v11 }
 0x1d5   :  { %v2096_v58 = vpop.f32.mrb[0].mxu1 }
 0x1d6   :  { %v233_v59 = vpop.f32.mrb[1].mxu1  ;;  %v253_v2 = vmax.f32 %v2096_v58, 0.0  ;;  %v530_v58 = vld [vmem:[#allocation2 + $0x10] sm:$0xff] }
 0x1d7   :  { %v252_v63 = vmax.f32 %v233_v59, 0.0  ;;  %v531_v59 = vld [vmem:[#allocation2 + $0x18] sm:$0xff] }
 0x1d8   :  { %v259_v5 = vadd.f32 %v253_v2, %v145_v45  ;;  %v538_v2 = vld [vmem:[#allocation2 + $0x50] sm:$0xff] }
 0x1d9   :  { %v2099_v60 = vpop.f32.mrb[2].mxu1  ;;  %v258_v4 = vadd.f32 %v252_v63, %v144_v44  ;;  %v535_v63 = vld [vmem:[#allocation2 + $0x38] sm:$0xff] }
 0x1da   :  { %v255_v61 = vmax.f32 %v2099_v60, 0.0  ;;  %v243_v62 = vpop.f32.mrb[3].mxu1  ;;  %v532_v60 = vld [vmem:[#allocation2 + $0x20] sm:$0xff] }
 0x1db   :  { %v254_v0 = vmax.f32 %v243_v62, 0.0  ;;  %v534_v62 = vld [vmem:[#allocation2 + $0x30] sm:$0xff] }
 0x1dc   :  { %v257_v3 = vadd.f32 %v255_v61, %v143_v43  ;;  %v533_v61 = vld [vmem:[#allocation2 + $0x28] sm:$0xff] }
 0x1dd   :  { %v256_v1 = vadd.f32 %v254_v0, %v142_v37  ;;  %v536_v0 = vld [vmem:[#allocation2 + $0x40] sm:$0xff] }
 0x1df   :  { %2116 = vmatprep.mubr.msk.f32.mxu0 %vm40_vm0, %v256_v1 }
 0x1e0   :  { %2117 = vmatmul.mubr.msk.f32.vlgmr.msra.gmra.mrb[4].mxu0 %vm40_vm0, %v257_v3 }
 0x1e1   :  { %2119 = vmatprep.mubr.msk.f32.mxu0 %vm40_vm0, %v258_v4 }
 0x1e4   :  { %2120 = vmatmul.mubr.msk.f32.gmra.mrb[6].mxu0 %vm40_vm0, %v259_v5 }
 0x1e5   :  { %2176 = vmatprep.mubr.f32.mxu0 %v528_v38 }
 0x2b3   :  { %v2118_v12 = vpop.f32.mrb[4].mxu0 }
 0x2b4   :  { %v347_v13 = vpop.f32.mrb[5].mxu0  ;;  %v367_v16 = vmax.f32 %v2118_v12, 0.0 }
 0x2b5   :  { %v366_v14 = vmax.f32 %v347_v13, 0.0 }
 0x2b6   :  { %v372_v22 = vadd.f32 %v367_v16, %v258_v4  ;;  %v540_v4 = vld [vmem:[#allocation2 + $0x60] sm:$0xff] }
 0x2b7   :  { %v2121_v15 = vpop.f32.mrb[6].mxu0  ;;  %v371_v20 = vadd.f32 %v366_v14, %v257_v3  ;;  %v539_v3 = vld [vmem:[#allocation2 + $0x58] sm:$0xff] }
 0x2b8   :  { %v369_v17 = vmax.f32 %v2121_v15, 0.0  ;;  %v357_v18 = vpop.f32.mrb[7].mxu0 }
 0x2b9   :  { %v368_v21 = vmax.f32 %v357_v18, 0.0 }
 0x2ba   :  { %v370_v19 = vadd.f32 %v369_v17, %v256_v1  ;;  %v537_v1 = vld [vmem:[#allocation2 + $0x48] sm:$0xff] }
 0x2bb   :  { %v373_v23 = vadd.f32 %v368_v21, %v259_v5  ;;  %v541_v5 = vld [vmem:[#allocation2 + $0x68] sm:$0xff] }
 0x2bc   :  { %2138 = vmatprep.mubr.msk.f32.mxu1 %vm40_vm0, %v370_v19 }
 0x2bd   :  { %2139 = vmatmul.mubr.msk.f32.vlgmr.msra.gmra.mrb[4].mxu1 %vm40_vm0, %v371_v20 }
 0x2be   :  { %2141 = vmatprep.mubr.msk.f32.mxu1 %vm40_vm0, %v372_v22 }
 0x2c1   :  { %2142 = vmatmul.mubr.msk.f32.gmra.mrb[6].mxu1 %vm40_vm0, %v373_v23 }
 0x390   :  { %v2140_v24 = vpop.f32.mrb[4].mxu1 }
 0x391   :  { %v461_v25 = vpop.f32.mrb[5].mxu1  ;;  %v481_v27 = vmax.f32 %v2140_v24, 0.0 }
 0x392   :  { %v480_v26 = vmax.f32 %v461_v25, 0.0 }
 0x393   :  { %v2768_v34 = vadd.f32 %v481_v27, %v373_v23 }
 0x394   :  { %v2763_v28 = vadd.f32 %v480_v26, %v372_v22  ;;  %v2143_v29 = vpop.f32.mrb[6].mxu1 }
 0x395   :  { %v483_v30 = vmax.f32 %v2143_v29, 0.0  ;;  %v471_v31 = vpop.f32.mrb[7].mxu1 }
 0x396   :  { %v482_v32 = vmax.f32 %v471_v31, 0.0  ;;  %496 = vrot.lane.b32.xlu1 %v2763_v28, %s2598_s1  ;;  %v2436_v37 = vpack.c.bf16 %v2768_v34, %v2763_v28 }
 0x397   :  { %v2766_v33 = vadd.f32 %v483_v30, %v371_v20 }
 0x398   :  { %v2770_v35 = vadd.f32 %v482_v32, %v370_v19 }
 0x39a   :  { %498 = vrot.lane.b32.xlu1 %v2768_v34, %s2598_s1  ;;  %492 = vrot.lane.b32.xlu0 %v2770_v35, %s2598_s1  ;;  %v2432_v36 = vpack.c.bf16 %v2766_v33, %v2770_v35 }
 0x39c   :  { %2433 = vmatprep.subr.bf16.mxu0 %v2432_v36 }
 0x39d   :  { %2435 = vmatpush3.bf16.msra.mxu0 %v2432_v36 }
 0x39e   :  { %506 = vrot.lane.b32.xlu1 %v2766_v33, %s2599_s14  ;;  %494 = vrot.lane.b32.xlu0 %v2766_v33, %s2598_s1 }
 0x39f   :  { %2437 = vmatprep.subr.bf16.mxu0 %v2436_v37 }
 0x3a1   :  { %2439 = vmatpush3.bf16.msra.mxu0 %v2436_v37 }
 0x3a2   :  { %510 = vrot.lane.b32.xlu1 %v2768_v34, %s2599_s14  ;;  %504 = vrot.lane.b32.xlu0 %v2770_v35, %s2599_s14 }
 0x3a6   :  { %518 = vrot.lane.b32.xlu1 %v2766_v33, %s2600_s15  ;;  %508 = vrot.lane.b32.xlu0 %v2763_v28, %s2599_s14 }
 0x3aa   :  { %522 = vrot.lane.b32.xlu1 %v2768_v34, %s2600_s15  ;;  %516 = vrot.lane.b32.xlu0 %v2770_v35, %s2600_s15 }
 0x3ae   :  { %520 = vrot.lane.b32.xlu0 %v2763_v28, %s2600_s15 }
 0x408   :  { %v2787_v39 = vpop.permute.xlu1 %496 }
 0x40c   :  { %v2789_v40 = vpop.permute.xlu1 %498  ;;  %v2791_v41 = vpop.permute.xlu0 %492 }
 0x40d   :  { %v2444_v45 = vpack.c.bf16 %v2789_v40, %v2787_v39 }
 0x410   :  { %v2793_v42 = vpop.permute.xlu1 %506  ;;  %v2795_v43 = vpop.permute.xlu0 %494 }
 0x411   :  { %v2440_v44 = vpack.c.bf16 %v2795_v43, %v2791_v41 }
 0x413   :  { %2441 = vmatprep.subr.bf16.mxu0 %v2440_v44 }
 0x414   :  { %v2801_v46 = vpop.permute.xlu0 %504  ;;  %2443 = vmatpush3.bf16.msra.mxu0 %v2440_v44  ;;  %v2803_v47 = vpop.permute.xlu1 %510 }
 0x415   :  { %2445 = vmatprep.subr.bf16.mxu0 %v2444_v45  ;;  %v2448_v48 = vpack.c.bf16 %v2793_v42, %v2801_v46 }
 0x418   :  { %v2807_v49 = vpop.permute.xlu0 %508  ;;  %2447 = vmatpush3.bf16.msra.mxu0 %v2444_v45  ;;  %v2811_v51 = vpop.permute.xlu1 %518 }
 0x419   :  { %2449 = vmatprep.subr.bf16.mxu0 %v2448_v48  ;;  %v2452_v50 = vpack.c.bf16 %v2803_v47, %v2807_v49 }
 0x41c   :  { %v2813_v52 = vpop.permute.xlu0 %516  ;;  %2451 = vmatpush3.bf16.msra.mxu0 %v2448_v48  ;;  %v2819_v55 = vpop.permute.xlu1 %522 }
 0x41d   :  { %2453 = vmatprep.subr.bf16.mxu0 %v2452_v50  ;;  %v2456_v53 = vpack.c.bf16 %v2811_v51, %v2813_v52 }
 0x420   :  { %v2817_v54 = vpop.permute.xlu0 %520  ;;  %2455 = vmatpush3.bf16.msra.mxu0 %v2452_v50 }
 0x421   :  { %2457 = vmatprep.subr.bf16.mxu0 %v2456_v53  ;;  %v2460_v56 = vpack.c.bf16 %v2819_v55, %v2817_v54 }
 0x424   :  { %2459 = vmatpush3.bf16.msra.mxu0 %v2456_v53 }
 0x425   :  { %2461 = vmatprep.subr.bf16.mxu0 %v2460_v56 }
 0x428   :  { %2463 = vmatpush3.bf16.msra.mxu0 %v2460_v56  ;;  %v851_v56 = vld [vmem:[#allocation2 + $0x80] sm:$0xff] }
 0x429   :  { %2232 = vmatprep.mubr.f32.mxu1 %v851_v56 }
 0x42b   :  { %2177 = vmatmul.mubr.f32.vlgmr.msra.gmra.mrb[8].mxu0 %v529_v57 }
 0x42c   :  { %2179 = vmatprep.mubr.f32.mxu0 %v530_v58 }
 0x42f   :  { %2180 = vmatmul.mubr.f32.gmra.mrb[10].mxu0 %v531_v59 }
 0x430   :  { %2182 = vmatprep.mubr.f32.mxu0 %v532_v60 }
 0x433   :  { %2183 = vmatmul.mubr.f32.gmra.mrb[12].mxu0 %v533_v61 }
 0x434   :  { %2185 = vmatprep.mubr.f32.mxu0 %v534_v62 }
 0x437   :  { %2186 = vmatmul.mubr.f32.gmra.mrb[14].mxu0 %v535_v63 }
 0x438   :  { %2188 = vmatprep.mubr.f32.mxu0 %v536_v0 }
 0x43b   :  { %2189 = vmatmul.mubr.f32.gmra.mrb[16].mxu0 %v537_v1 }
 0x43c   :  { %2191 = vmatprep.mubr.f32.mxu0 %v538_v2 }
 0x43f   :  { %2192 = vmatmul.mubr.f32.gmra.mrb[18].mxu0 %v539_v3 }
 0x440   :  { %2194 = vmatprep.mubr.f32.mxu0 %v540_v4 }
 0x443   :  { %2195 = vmatmul.mubr.f32.gmra.mrb[20].mxu0 %v541_v5 }
 0x444   :  { %2197 = vmatprep.mubr.f32.mxu0 %v542_v6 }
 0x447   :  { %2198 = vmatmul.mubr.f32.gmra.mrb[22].mxu0 %v543_v7 }
 0x4fe   :  { %v2178_v8 = vpop.f32.mrb[8].mxu0 }
 0x4ff   :  { %v690_v9 = vmax.f32 %v2178_v8, 0.0  ;;  %v610_v10 = vpop.f32.mrb[9].mxu0 }
 0x500   :  { %v689_v11 = vmax.f32 %v610_v10, 0.0 }
 0x501   :  { %723 = vrot.lane.b32.xlu1 %v690_v9, %s2601_s16 }
 0x502   :  { %721 = vrot.lane.b32.xlu0 %v689_v11, %s2601_s16  ;;  %v2181_v12 = vpop.f32.mrb[10].mxu0 }
 0x503   :  { %v620_v13 = vpop.f32.mrb[11].mxu0  ;;  %v692_v14 = vmax.f32 %v2181_v12, 0.0 }
 0x504   :  { %v691_v15 = vmax.f32 %v620_v13, 0.0 }
 0x505   :  { %771 = vrot.lane.b32.xlu1 %v690_v9, %s2602_s17 }
 0x506   :  { %769 = vrot.lane.b32.xlu0 %v689_v11, %s2602_s17  ;;  %v2184_v16 = vpop.f32.mrb[12].mxu0 }
 0x507   :  { %v630_v17 = vpop.f32.mrb[13].mxu0  ;;  %v694_v20 = vmax.f32 %v2184_v16, 0.0 }
 0x508   :  { %v693_v21 = vmax.f32 %v630_v17, 0.0 }
 0x509   :  { %727 = vrot.lane.b32.xlu1 %v692_v14, %s2601_s16 }
 0x50a   :  { %725 = vrot.lane.b32.xlu0 %v691_v15, %s2601_s16  ;;  %v2187_v18 = vpop.f32.mrb[14].mxu0 }
 0x50b   :  { %v640_v19 = vpop.f32.mrb[15].mxu0  ;;  %v696_v26 = vmax.f32 %v2187_v18, 0.0 }
 0x50c   :  { %v695_v27 = vmax.f32 %v640_v19, 0.0 }
 0x50d   :  { %775 = vrot.lane.b32.xlu1 %v692_v14, %s2602_s17 }
 0x50e   :  { %773 = vrot.lane.b32.xlu0 %v691_v15, %s2602_s17  ;;  %v2190_v22 = vpop.f32.mrb[16].mxu0 }
 0x50f   :  { %v650_v23 = vpop.f32.mrb[17].mxu0  ;;  %v698_v36 = vmax.f32 %v2190_v22, 0.0 }
 0x510   :  { %v697_v37 = vmax.f32 %v650_v23, 0.0 }
 0x511   :  { %731 = vrot.lane.b32.xlu1 %v694_v20, %s2601_s16 }
 0x512   :  { %729 = vrot.lane.b32.xlu0 %v693_v21, %s2601_s16  ;;  %v2193_v24 = vpop.f32.mrb[18].mxu0 }
 0x513   :  { %v660_v25 = vpop.f32.mrb[19].mxu0  ;;  %v700_v38 = vmax.f32 %v2193_v24, 0.0 }
 0x514   :  { %v699_v44 = vmax.f32 %v660_v25, 0.0 }
 0x515   :  { %779 = vrot.lane.b32.xlu1 %v694_v20, %s2602_s17 }
 0x516   :  { %777 = vrot.lane.b32.xlu0 %v693_v21, %s2602_s17  ;;  %v2196_v29 = vpop.f32.mrb[20].mxu0 }
 0x517   :  { %v670_v30 = vpop.f32.mrb[21].mxu0  ;;  %v702_v45 = vmax.f32 %v2196_v29, 0.0 }
 0x518   :  { %v701_v48 = vmax.f32 %v670_v30, 0.0 }
 0x519   :  { %735 = vrot.lane.b32.xlu1 %v696_v26, %s2601_s16 }
 0x51a   :  { %733 = vrot.lane.b32.xlu0 %v695_v27, %s2601_s16  ;;  %v2199_v31 = vpop.f32.mrb[22].mxu0 }
 0x51b   :  { %v680_v32 = vpop.f32.mrb[23].mxu0  ;;  %v704_v50 = vmax.f32 %v2199_v31, 0.0 }
 0x51c   :  { %v703_v53 = vmax.f32 %v680_v32, 0.0 }
 0x51d   :  { %783 = vrot.lane.b32.xlu1 %v696_v26, %s2602_s17 }
 0x51e   :  { %781 = vrot.lane.b32.xlu0 %v695_v27, %s2602_s17 }
 0x521   :  { %739 = vrot.lane.b32.xlu1 %v698_v36, %s2601_s16 }
 0x522   :  { %737 = vrot.lane.b32.xlu0 %v697_v37, %s2601_s16 }
 0x525   :  { %787 = vrot.lane.b32.xlu1 %v698_v36, %s2602_s17 }
 0x526   :  { %785 = vrot.lane.b32.xlu0 %v697_v37, %s2602_s17 }
 0x529   :  { %743 = vrot.lane.b32.xlu1 %v700_v38, %s2601_s16 }
 0x52a   :  { %741 = vrot.lane.b32.xlu0 %v699_v44, %s2601_s16 }
 0x52d   :  { %791 = vrot.lane.b32.xlu1 %v700_v38, %s2602_s17 }
 0x52e   :  { %789 = vrot.lane.b32.xlu0 %v699_v44, %s2602_s17 }
 0x531   :  { %747 = vrot.lane.b32.xlu1 %v702_v45, %s2601_s16 }
 0x532   :  { %745 = vrot.lane.b32.xlu0 %v701_v48, %s2601_s16 }
 0x535   :  { %795 = vrot.lane.b32.xlu1 %v702_v45, %s2602_s17 }
 0x536   :  { %793 = vrot.lane.b32.xlu0 %v701_v48, %s2602_s17 }
 0x539   :  { %751 = vrot.lane.b32.xlu1 %v704_v50, %s2601_s16 }
 0x53a   :  { %749 = vrot.lane.b32.xlu0 %v703_v53, %s2601_s16 }
 0x53d   :  { %799 = vrot.lane.b32.xlu1 %v704_v50, %s2602_s17 }
 0x53e   :  { %797 = vrot.lane.b32.xlu0 %v703_v53, %s2602_s17 }
 0x573   :  { %v724_v57 = vpop.permute.xlu1 %723 }
 0x574   :  { %v722_v58 = vpop.permute.xlu0 %721 }
 0x577   :  { %v772_v59 = vpop.permute.xlu1 %771 }
 0x578   :  { %v819_v60 = vsel %vm817_vm1, %v724_v57, %v772_v59  ;;  %v770_v61 = vpop.permute.xlu0 %769 }
 0x579   :  { %v2857_v62 = vadd.f32 %v819_v60, %v2766_v33  ;;  %v818_v63 = vsel %vm817_vm1, %v722_v58, %v770_v61 }
 0x57a   :  { %v2861_v0 = vadd.f32 %v818_v63, %v2770_v35 }
 0x57b   :  { %v728_v1 = vpop.permute.xlu1 %727 }
 0x57c   :  { %v726_v2 = vpop.permute.xlu0 %725  ;;  %v2464_v3 = vpack.c.bf16 %v2857_v62, %v2861_v0 }
 0x57e   :  { %2465 = vmatprep.subr.bf16.mxu1 %v2464_v3 }
 0x57f   :  { %2467 = vmatpush3.bf16.msra.mxu1 %v2464_v3  ;;  %v776_v4 = vpop.permute.xlu1 %775 }
 0x580   :  { %v821_v5 = vsel %vm817_vm1, %v728_v1, %v776_v4  ;;  %v774_v6 = vpop.permute.xlu0 %773 }
 0x581   :  { %v2867_v7 = vadd.f32 %v821_v5, %v2768_v34  ;;  %v820_v33 = vsel %vm817_vm1, %v726_v2, %v774_v6  ;;  %v852_v5 = vld [vmem:[#allocation2 + $0x88] sm:$0xff]  ;;  %v853_v6 = vld [vmem:[#allocation2 + $0x90] sm:$0xff] }
 0x582   :  { %v2871_v8 = vadd.f32 %v820_v33, %v2763_v28  ;;  %v854_v33 = vld [vmem:[#allocation2 + $0x98] sm:$0xff] }
 0x583   :  { %v732_v35 = vpop.permute.xlu1 %731 }
 0x584   :  { %v730_v9 = vpop.permute.xlu0 %729  ;;  %v2468_v10 = vpack.c.bf16 %v2867_v7, %v2871_v8 }
 0x586   :  { %2469 = vmatprep.subr.bf16.mxu1 %v2468_v10 }
 0x587   :  { %2471 = vmatpush3.bf16.msra.mxu1 %v2468_v10  ;;  %v780_v11 = vpop.permute.xlu1 %779  ;;  %v858_v10 = vld [vmem:[#allocation2 + $0xb8] sm:$0xff] }
 0x588   :  { %v823_v12 = vsel %vm817_vm1, %v732_v35, %v780_v11  ;;  %v778_v13 = vpop.permute.xlu0 %777  ;;  %v855_v35 = vld [vmem:[#allocation2 + $0xa0] sm:$0xff]  ;;  %v860_v11 = vld [vmem:[#allocation2 + $0xc8] sm:$0xff] }
 0x589   :  { %v2877_v14 = vadd.f32 %v823_v12, %v2795_v43  ;;  %v822_v34 = vsel %vm817_vm1, %v730_v9, %v778_v13  ;;  %v857_v9 = vld [vmem:[#allocation2 + $0xb0] sm:$0xff]  ;;  %v862_v13 = vld [vmem:[#allocation2 + $0xd8] sm:$0xff] }
 0x58a   :  { %v2881_v15 = vadd.f32 %v822_v34, %v2791_v41  ;;  %v861_v12 = vld [vmem:[#allocation2 + $0xd0] sm:$0xff]  ;;  %v863_v34 = vld [vmem:[#allocation2 + $0xe0] sm:$0xff] }
 0x58b   :  { %v736_v28 = vpop.permute.xlu1 %735 }
 0x58c   :  { %v734_v16 = vpop.permute.xlu0 %733  ;;  %v2472_v17 = vpack.c.bf16 %v2877_v14, %v2881_v15 }
 0x58e   :  { %2473 = vmatprep.subr.bf16.mxu1 %v2472_v17 }
 0x58f   :  { %2475 = vmatpush3.bf16.msra.mxu1 %v2472_v17  ;;  %v784_v18 = vpop.permute.xlu1 %783  ;;  %v866_v17 = vld [vmem:[#allocation2 + $0xf8] sm:$0xff] }
 0x590   :  { %v825_v19 = vsel %vm817_vm1, %v736_v28, %v784_v18  ;;  %v782_v20 = vpop.permute.xlu0 %781  ;;  %v864_v28 = vld [vmem:[#allocation2 + $0xe8] sm:$0xff] }
 0x591   :  { %v2887_v21 = vadd.f32 %v825_v19, %v2789_v40  ;;  %v824_v43 = vsel %vm817_vm1, %v734_v16, %v782_v20  ;;  %v865_v16 = vld [vmem:[#allocation2 + $0xf0] sm:$0xff] }
 0x592   :  { %v2891_v22 = vadd.f32 %v824_v43, %v2787_v39 }
 0x593   :  { %v740_v41 = vpop.permute.xlu1 %739 }
 0x594   :  { %v738_v23 = vpop.permute.xlu0 %737  ;;  %v2476_v24 = vpack.c.bf16 %v2887_v21, %v2891_v22 }
 0x596   :  { %2477 = vmatprep.subr.bf16.mxu1 %v2476_v24 }
 0x597   :  { %2479 = vmatpush3.bf16.msra.mxu1 %v2476_v24  ;;  %v788_v25 = vpop.permute.xlu1 %787 }
 0x598   :  { %v827_v26 = vsel %vm817_vm1, %v740_v41, %v788_v25  ;;  %v786_v27 = vpop.permute.xlu0 %785 }
 0x599   :  { %v2897_v29 = vadd.f32 %v827_v26, %v2793_v42  ;;  %v826_v40 = vsel %vm817_vm1, %v738_v23, %v786_v27 }
 0x59a   :  { %v2901_v30 = vadd.f32 %v826_v40, %v2801_v46 }
 0x59b   :  { %v744_v39 = vpop.permute.xlu1 %743 }
 0x59c   :  { %v742_v31 = vpop.permute.xlu0 %741  ;;  %v2480_v32 = vpack.c.bf16 %v2897_v29, %v2901_v30 }
 0x59e   :  { %2481 = vmatprep.subr.bf16.mxu1 %v2480_v32 }
 0x59f   :  { %2483 = vmatpush3.bf16.msra.mxu1 %v2480_v32  ;;  %v792_v36 = vpop.permute.xlu1 %791 }
 0x5a0   :  { %v829_v37 = vsel %vm817_vm1, %v744_v39, %v792_v36  ;;  %v790_v38 = vpop.permute.xlu0 %789 }
 0x5a1   :  { %v2907_v44 = vadd.f32 %v829_v37, %v2803_v47  ;;  %v828_v42 = vsel %vm817_vm1, %v742_v31, %v790_v38 }
 0x5a2   :  { %v2911_v45 = vadd.f32 %v828_v42, %v2807_v49 }
 0x5a3   :  { %v748_v46 = vpop.permute.xlu1 %747 }
 0x5a4   :  { %v746_v48 = vpop.permute.xlu0 %745  ;;  %v2484_v50 = vpack.c.bf16 %v2907_v44, %v2911_v45 }
 0x5a6   :  { %2485 = vmatprep.subr.bf16.mxu1 %v2484_v50 }
 0x5a7   :  { %2487 = vmatpush3.bf16.msra.mxu1 %v2484_v50  ;;  %v796_v53 = vpop.permute.xlu1 %795 }
 0x5a8   :  { %v831_v56 = vsel %vm817_vm1, %v748_v46, %v796_v53  ;;  %v794_v57 = vpop.permute.xlu0 %793 }
 0x5a9   :  { %v2917_v58 = vadd.f32 %v831_v56, %v2811_v51  ;;  %v830_v47 = vsel %vm817_vm1, %v746_v48, %v794_v57 }
 0x5aa   :  { %v2921_v59 = vadd.f32 %v830_v47, %v2813_v52 }
 0x5ab   :  { %v752_v49 = vpop.permute.xlu1 %751 }
 0x5ac   :  { %v750_v60 = vpop.permute.xlu0 %749  ;;  %v2488_v61 = vpack.c.bf16 %v2917_v58, %v2921_v59 }
 0x5ae   :  { %2489 = vmatprep.subr.bf16.mxu1 %v2488_v61 }
 0x5af   :  { %2491 = vmatpush3.bf16.msra.mxu1 %v2488_v61  ;;  %v800_v63 = vpop.permute.xlu1 %799 }
 0x5b0   :  { %v833_v1 = vsel %vm817_vm1, %v752_v49, %v800_v63  ;;  %v798_v2 = vpop.permute.xlu0 %797 }
 0x5b1   :  { %v2927_v3 = vadd.f32 %v833_v1, %v2819_v55  ;;  %v832_v51 = vsel %vm817_vm1, %v750_v60, %v798_v2  ;;  %v856_v55 = vld [vmem:[#allocation2 + $0xa8] sm:$0xff] }
 0x5b2   :  { %v2931_v4 = vadd.f32 %v832_v51, %v2817_v54  ;;  %v859_v54 = vld [vmem:[#allocation2 + $0xc0] sm:$0xff] }
 0x5b4   :  { %v2492_v52 = vpack.c.bf16 %v2927_v3, %v2931_v4 }
 0x5b6   :  { %2493 = vmatprep.subr.bf16.mxu1 %v2492_v52 }
 0x5b7   :  { %2495 = vmatpush3.bf16.msra.mxu1 %v2492_v52  ;;  %v1174_v52 = vld [vmem:[#allocation2 + $0x100] sm:$0xff] }
 0x5b8   :  { %2288 = vmatprep.mubr.f32.mxu0 %v1174_v52 }
 0x5ba   :  { %2233 = vmatmul.mubr.f32.vlgmr.msra.gmra.mrb[8].mxu1 %v852_v5 }
 0x5bb   :  { %2235 = vmatprep.mubr.f32.mxu1 %v853_v6 }
 0x5be   :  { %2236 = vmatmul.mubr.f32.gmra.mrb[10].mxu1 %v854_v33 }
 0x5bf   :  { %2238 = vmatprep.mubr.f32.mxu1 %v855_v35 }
 0x5c2   :  { %2239 = vmatmul.mubr.f32.gmra.mrb[12].mxu1 %v856_v55 }
 0x5c3   :  { %2241 = vmatprep.mubr.f32.mxu1 %v857_v9 }
 0x5c6   :  { %2242 = vmatmul.mubr.f32.gmra.mrb[14].mxu1 %v858_v10 }
 0x5c7   :  { %2244 = vmatprep.mubr.f32.mxu1 %v859_v54 }
 0x5ca   :  { %2245 = vmatmul.mubr.f32.gmra.mrb[16].mxu1 %v860_v11 }
 0x5cb   :  { %2247 = vmatprep.mubr.f32.mxu1 %v861_v12 }
 0x5ce   :  { %2248 = vmatmul.mubr.f32.gmra.mrb[18].mxu1 %v862_v13 }
 0x5cf   :  { %2250 = vmatprep.mubr.f32.mxu1 %v863_v34 }
 0x5d2   :  { %2251 = vmatmul.mubr.f32.gmra.mrb[20].mxu1 %v864_v28 }
 0x5d3   :  { %2253 = vmatprep.mubr.f32.mxu1 %v865_v16 }
 0x5d6   :  { %2254 = vmatmul.mubr.f32.gmra.mrb[22].mxu1 %v866_v17 }
 0x68d   :  { %v2234_v18 = vpop.f32.mrb[8].mxu1 }
 0x68e   :  { %v1013_v19 = vmax.f32 %v2234_v18, 0.0  ;;  %v933_v20 = vpop.f32.mrb[9].mxu1 }
 0x68f   :  { %v1012_v43 = vmax.f32 %v933_v20, 0.0 }
 0x690   :  { %1046 = vrot.lane.b32.xlu1 %v1013_v19, %s2603_s18 }
 0x691   :  { %1044 = vrot.lane.b32.xlu0 %v1012_v43, %s2603_s18  ;;  %v2237_v41 = vpop.f32.mrb[10].mxu1 }
 0x692   :  { %v943_v23 = vpop.f32.mrb[11].mxu1  ;;  %v1015_v24 = vmax.f32 %v2237_v41, 0.0 }
 0x693   :  { %v1014_v25 = vmax.f32 %v943_v23, 0.0 }
 0x694   :  { %1094 = vrot.lane.b32.xlu1 %v1013_v19, %s2597_s23 }
 0x695   :  { %1092 = vrot.lane.b32.xlu0 %v1012_v43, %s2597_s23  ;;  %v2240_v26 = vpop.f32.mrb[12].mxu1 }
 0x696   :  { %v953_v27 = vpop.f32.mrb[13].mxu1  ;;  %v1017_v31 = vmax.f32 %v2240_v26, 0.0 }
 0x697   :  { %v1016_v32 = vmax.f32 %v953_v27, 0.0 }
 0x698   :  { %1050 = vrot.lane.b32.xlu1 %v1015_v24, %s2603_s18 }
 0x699   :  { %1048 = vrot.lane.b32.xlu0 %v1014_v25, %s2603_s18  ;;  %v2243_v40 = vpop.f32.mrb[14].mxu1 }
 0x69a   :  { %v963_v39 = vpop.f32.mrb[15].mxu1  ;;  %v1019_v46 = vmax.f32 %v2243_v40, 0.0 }
 0x69b   :  { %v1018_v48 = vmax.f32 %v963_v39, 0.0 }
 0x69c   :  { %1098 = vrot.lane.b32.xlu1 %v1015_v24, %s2597_s23 }
 0x69d   :  { %1096 = vrot.lane.b32.xlu0 %v1014_v25, %s2597_s23  ;;  %v2246_v36 = vpop.f32.mrb[16].mxu1 }
 0x69e   :  { %v973_v37 = vpop.f32.mrb[17].mxu1  ;;  %v1021_v47 = vmax.f32 %v2246_v36, 0.0 }
 0x69f   :  { %v1020_v49 = vmax.f32 %v973_v37, 0.0 }
 0x6a0   :  { %1054 = vrot.lane.b32.xlu1 %v1017_v31, %s2603_s18 }
 0x6a1   :  { %1052 = vrot.lane.b32.xlu0 %v1016_v32, %s2603_s18  ;;  %v2249_v38 = vpop.f32.mrb[18].mxu1 }
 0x6a2   :  { %v983_v42 = vpop.f32.mrb[19].mxu1  ;;  %v1023_v60 = vmax.f32 %v2249_v38, 0.0 }
 0x6a3   :  { %v1022_v61 = vmax.f32 %v983_v42, 0.0 }
 0x6a4   :  { %1102 = vrot.lane.b32.xlu1 %v1017_v31, %s2597_s23 }
 0x6a5   :  { %1100 = vrot.lane.b32.xlu0 %v1016_v32, %s2597_s23  ;;  %v2252_v50 = vpop.f32.mrb[20].mxu1 }
 0x6a6   :  { %v993_v53 = vpop.f32.mrb[21].mxu1  ;;  %v1025_v63 = vmax.f32 %v2252_v50, 0.0 }
 0x6a7   :  { %v1024_v1 = vmax.f32 %v993_v53, 0.0 }
 0x6a8   :  { %1058 = vrot.lane.b32.xlu1 %v1019_v46, %s2603_s18 }
 0x6a9   :  { %1056 = vrot.lane.b32.xlu0 %v1018_v48, %s2603_s18  ;;  %v2255_v56 = vpop.f32.mrb[22].mxu1 }
 0x6aa   :  { %v1003_v57 = vpop.f32.mrb[23].mxu1  ;;  %v1027_v2 = vmax.f32 %v2255_v56, 0.0 }
 0x6ab   :  { %v1026_v51 = vmax.f32 %v1003_v57, 0.0 }
 0x6ac   :  { %1106 = vrot.lane.b32.xlu1 %v1019_v46, %s2597_s23 }
 0x6ad   :  { %1104 = vrot.lane.b32.xlu0 %v1018_v48, %s2597_s23 }
 0x6b0   :  { %1062 = vrot.lane.b32.xlu1 %v1021_v47, %s2603_s18 }
 0x6b1   :  { %1060 = vrot.lane.b32.xlu0 %v1020_v49, %s2603_s18 }
 0x6b4   :  { %1110 = vrot.lane.b32.xlu1 %v1021_v47, %s2597_s23 }
 0x6b5   :  { %1108 = vrot.lane.b32.xlu0 %v1020_v49, %s2597_s23 }
 0x6b8   :  { %1066 = vrot.lane.b32.xlu1 %v1023_v60, %s2603_s18 }
 0x6b9   :  { %1064 = vrot.lane.b32.xlu0 %v1022_v61, %s2603_s18 }
 0x6bc   :  { %1114 = vrot.lane.b32.xlu1 %v1023_v60, %s2597_s23 }
 0x6bd   :  { %1112 = vrot.lane.b32.xlu0 %v1022_v61, %s2597_s23 }
 0x6c0   :  { %1070 = vrot.lane.b32.xlu1 %v1025_v63, %s2603_s18 }
 0x6c1   :  { %1068 = vrot.lane.b32.xlu0 %v1024_v1, %s2603_s18 }
 0x6c4   :  { %1118 = vrot.lane.b32.xlu1 %v1025_v63, %s2597_s23 }
 0x6c5   :  { %1116 = vrot.lane.b32.xlu0 %v1024_v1, %s2597_s23 }
 0x6c8   :  { %1074 = vrot.lane.b32.xlu1 %v1027_v2, %s2603_s18 }
 0x6c9   :  { %1072 = vrot.lane.b32.xlu0 %v1026_v51, %s2603_s18 }
 0x6cc   :  { %1122 = vrot.lane.b32.xlu1 %v1027_v2, %s2597_s23 }
 0x6cd   :  { %1120 = vrot.lane.b32.xlu0 %v1026_v51, %s2597_s23 }
 0x702   :  { %v1047_v5 = vpop.permute.xlu1 %1046 }
 0x703   :  { %v1045_v6 = vpop.permute.xlu0 %1044 }
 0x706   :  { %v1095_v33 = vpop.permute.xlu1 %1094 }
 0x707   :  { %v1142_v35 = vsel %vm1140_vm2, %v1047_v5, %v1095_v33  ;;  %v1093_v55 = vpop.permute.xlu0 %1092 }
 0x708   :  { %v2969_v9 = vadd.f32 %v1142_v35, %v2857_v62  ;;  %v1141_v10 = vsel %vm1140_vm2, %v1045_v6, %v1093_v55 }
 0x709   :  { %v2973_v54 = vadd.f32 %v1141_v10, %v2861_v0 }
 0x70a   :  { %v1051_v11 = vpop.permute.xlu1 %1050 }
 0x70b   :  { %v1049_v12 = vpop.permute.xlu0 %1048  ;;  %v2496_v13 = vpack.c.bf16 %v2969_v9, %v2973_v54 }
 0x70d   :  { %2497 = vmatprep.subr.bf16.mxu0 %v2496_v13 }
 0x70e   :  { %2499 = vmatpush3.bf16.msra.mxu0 %v2496_v13  ;;  %v1099_v34 = vpop.permute.xlu1 %1098 }
 0x70f   :  { %v1144_v28 = vsel %vm1140_vm2, %v1051_v11, %v1099_v34  ;;  %v1097_v16 = vpop.permute.xlu0 %1096 }
 0x710   :  { %v2979_v17 = vadd.f32 %v1144_v28, %v2867_v7  ;;  %v1143_v62 = vsel %vm1140_vm2, %v1049_v12, %v1097_v16  ;;  %v1175_v28 = vld [vmem:[#allocation2 + $0x108] sm:$0xff]  ;;  %v1176_v16 = vld [vmem:[#allocation2 + $0x110] sm:$0xff] }
 0x711   :  { %v2983_v18 = vadd.f32 %v1143_v62, %v2871_v8  ;;  %v1177_v62 = vld [vmem:[#allocation2 + $0x118] sm:$0xff] }
 0x712   :  { %v1055_v0 = vpop.permute.xlu1 %1054 }
 0x713   :  { %v1053_v19 = vpop.permute.xlu0 %1052  ;;  %v2500_v20 = vpack.c.bf16 %v2979_v17, %v2983_v18 }
 0x715   :  { %2501 = vmatprep.subr.bf16.mxu0 %v2500_v20 }
 0x716   :  { %2503 = vmatpush3.bf16.msra.mxu0 %v2500_v20  ;;  %v1103_v43 = vpop.permute.xlu1 %1102  ;;  %v1181_v20 = vld [vmem:[#allocation2 + $0x138] sm:$0xff] }
 0x717   :  { %v1146_v41 = vsel %vm1140_vm2, %v1055_v0, %v1103_v43  ;;  %v1101_v23 = vpop.permute.xlu0 %1100  ;;  %v1178_v0 = vld [vmem:[#allocation2 + $0x120] sm:$0xff]  ;;  %v1183_v43 = vld [vmem:[#allocation2 + $0x148] sm:$0xff] }
 0x718   :  { %v2989_v24 = vadd.f32 %v1146_v41, %v2877_v14  ;;  %v1145_v7 = vsel %vm1140_vm2, %v1053_v19, %v1101_v23  ;;  %v1180_v19 = vld [vmem:[#allocation2 + $0x130] sm:$0xff]  ;;  %v1185_v23 = vld [vmem:[#allocation2 + $0x158] sm:$0xff] }
 0x719   :  { %v2993_v25 = vadd.f32 %v1145_v7, %v2881_v15  ;;  %v1184_v41 = vld [vmem:[#allocation2 + $0x150] sm:$0xff]  ;;  %v1186_v7 = vld [vmem:[#allocation2 + $0x160] sm:$0xff] }
 0x71a   :  { %v1059_v8 = vpop.permute.xlu1 %1058 }
 0x71b   :  { %v1057_v26 = vpop.permute.xlu0 %1056  ;;  %v2504_v27 = vpack.c.bf16 %v2989_v24, %v2993_v25 }
 0x71d   :  { %2505 = vmatprep.subr.bf16.mxu0 %v2504_v27 }
 0x71e   :  { %2507 = vmatpush3.bf16.msra.mxu0 %v2504_v27  ;;  %v1107_v40 = vpop.permute.xlu1 %1106  ;;  %v1189_v27 = vld [vmem:[#allocation2 + $0x178] sm:$0xff] }
 0x71f   :  { %v1148_v39 = vsel %vm1140_vm2, %v1059_v8, %v1107_v40  ;;  %v1105_v31 = vpop.permute.xlu0 %1104  ;;  %v1187_v8 = vld [vmem:[#allocation2 + $0x168] sm:$0xff] }
 0x720   :  { %v2999_v32 = vadd.f32 %v1148_v39, %v2887_v21  ;;  %v1147_v14 = vsel %vm1140_vm2, %v1057_v26, %v1105_v31  ;;  %v1188_v26 = vld [vmem:[#allocation2 + $0x170] sm:$0xff] }
 0x721   :  { %v3003_v36 = vadd.f32 %v1147_v14, %v2891_v22 }
 0x722   :  { %v1063_v15 = vpop.permute.xlu1 %1062 }
 0x723   :  { %v1061_v37 = vpop.permute.xlu0 %1060  ;;  %v2508_v38 = vpack.c.bf16 %v2999_v32, %v3003_v36 }
 0x725   :  { %2509 = vmatprep.subr.bf16.mxu0 %v2508_v38 }
 0x726   :  { %2511 = vmatpush3.bf16.msra.mxu0 %v2508_v38  ;;  %v1111_v42 = vpop.permute.xlu1 %1110 }
 0x727   :  { %v1150_v46 = vsel %vm1140_vm2, %v1063_v15, %v1111_v42  ;;  %v1109_v48 = vpop.permute.xlu0 %1108 }
 0x728   :  { %v3009_v50 = vadd.f32 %v1150_v46, %v2897_v29  ;;  %v1149_v21 = vsel %vm1140_vm2, %v1061_v37, %v1109_v48 }
 0x729   :  { %v3013_v53 = vadd.f32 %v1149_v21, %v2901_v30 }
 0x72a   :  { %v1067_v22 = vpop.permute.xlu1 %1066 }
 0x72b   :  { %v1065_v56 = vpop.permute.xlu0 %1064  ;;  %v2512_v57 = vpack.c.bf16 %v3009_v50, %v3013_v53 }
 0x72d   :  { %2513 = vmatprep.subr.bf16.mxu0 %v2512_v57 }
 0x72e   :  { %2515 = vmatpush3.bf16.msra.mxu0 %v2512_v57  ;;  %v1115_v47 = vpop.permute.xlu1 %1114 }
 0x72f   :  { %v1152_v49 = vsel %vm1140_vm2, %v1067_v22, %v1115_v47  ;;  %v1113_v60 = vpop.permute.xlu0 %1112 }
 0x730   :  { %v3019_v61 = vadd.f32 %v1152_v49, %v2907_v44  ;;  %v1151_v29 = vsel %vm1140_vm2, %v1065_v56, %v1113_v60 }
 0x731   :  { %v3023_v63 = vadd.f32 %v1151_v29, %v2911_v45 }
 0x732   :  { %v1071_v30 = vpop.permute.xlu1 %1070 }
 0x733   :  { %v1069_v1 = vpop.permute.xlu0 %1068  ;;  %v2516_v2 = vpack.c.bf16 %v3019_v61, %v3023_v63 }
 0x735   :  { %2517 = vmatprep.subr.bf16.mxu0 %v2516_v2 }
 0x736   :  { %2519 = vmatpush3.bf16.msra.mxu0 %v2516_v2  ;;  %v1119_v51 = vpop.permute.xlu1 %1118 }
 0x737   :  { %v1154_v52 = vsel %vm1140_vm2, %v1071_v30, %v1119_v51  ;;  %v1117_v5 = vpop.permute.xlu0 %1116 }
 0x738   :  { %v3029_v6 = vadd.f32 %v1154_v52, %v2917_v58  ;;  %v1153_v44 = vsel %vm1140_vm2, %v1069_v1, %v1117_v5 }
 0x739   :  { %v3033_v33 = vadd.f32 %v1153_v44, %v2921_v59 }
 0x73a   :  { %v1075_v45 = vpop.permute.xlu1 %1074 }
 0x73b   :  { %v1073_v35 = vpop.permute.xlu0 %1072  ;;  %v2520_v55 = vpack.c.bf16 %v3029_v6, %v3033_v33 }
 0x73d   :  { %2521 = vmatprep.subr.bf16.mxu0 %v2520_v55 }
 0x73e   :  { %2523 = vmatpush3.bf16.msra.mxu0 %v2520_v55  ;;  %v1123_v10 = vpop.permute.xlu1 %1122 }
 0x73f   :  { %v1156_v11 = vsel %vm1140_vm2, %v1075_v45, %v1123_v10  ;;  %v1121_v12 = vpop.permute.xlu0 %1120 }
 0x740   :  { %v3039_v13 = vadd.f32 %v1156_v11, %v2927_v3  ;;  %v1155_v58 = vsel %vm1140_vm2, %v1073_v35, %v1121_v12  ;;  %v1179_v3 = vld [vmem:[#allocation2 + $0x128] sm:$0xff] }
 0x741   :  { %v3043_v34 = vadd.f32 %v1155_v58, %v2931_v4  ;;  %v1182_v4 = vld [vmem:[#allocation2 + $0x140] sm:$0xff] }
 0x743   :  { %v2524_v59 = vpack.c.bf16 %v3039_v13, %v3043_v34 }
 0x745   :  { %2525 = vmatprep.subr.bf16.mxu0 %v2524_v59 }
 0x746   :  { %2527 = vmatpush3.bf16.msra.mxu0 %v2524_v59  ;;  %v1497_v59 = vld [vmem:[#allocation2 + $0x180] sm:$0xff] }
 0x747   :  { %2344 = vmatprep.mubr.f32.mxu1 %v1497_v59 }
 0x749   :  { %2289 = vmatmul.mubr.f32.vlgmr.msra.gmra.mrb[24].mxu0 %v1175_v28 }
 0x74a   :  { %2291 = vmatprep.mubr.f32.mxu0 %v1176_v16 }
 0x74d   :  { %2292 = vmatmul.mubr.f32.gmra.mrb[26].mxu0 %v1177_v62 }
 0x74e   :  { %2294 = vmatprep.mubr.f32.mxu0 %v1178_v0 }
 0x751   :  { %2295 = vmatmul.mubr.f32.gmra.mrb[28].mxu0 %v1179_v3 }
 0x752   :  { %2297 = vmatprep.mubr.f32.mxu0 %v1180_v19 }
 0x755   :  { %2298 = vmatmul.mubr.f32.gmra.mrb[30].mxu0 %v1181_v20 }
 0x756   :  { %2300 = vmatprep.mubr.f32.mxu0 %v1182_v4 }
 0x759   :  { %2301 = vmatmul.mubr.f32.gmra.mrb[32].mxu0 %v1183_v43 }
 0x75a   :  { %2303 = vmatprep.mubr.f32.mxu0 %v1184_v41 }
 0x75d   :  { %2304 = vmatmul.mubr.f32.gmra.mrb[34].mxu0 %v1185_v23 }
 0x75e   :  { %2306 = vmatprep.mubr.f32.mxu0 %v1186_v7 }
 0x761   :  { %2307 = vmatmul.mubr.f32.gmra.mrb[36].mxu0 %v1187_v8 }
 0x762   :  { %2309 = vmatprep.mubr.f32.mxu0 %v1188_v26 }
 0x765   :  { %2310 = vmatmul.mubr.f32.gmra.mrb[38].mxu0 %v1189_v27 }
 0x81c   :  { %v2290_v40 = vpop.f32.mrb[24].mxu0 }
 0x81d   :  { %v1336_v39 = vmax.f32 %v2290_v40, 0.0  ;;  %v1256_v31 = vpop.f32.mrb[25].mxu0 }
 0x81e   :  { %v1335_v14 = vmax.f32 %v1256_v31, 0.0 }
 0x81f   :  { %1369 = vrot.lane.b32.xlu1 %v1336_v39, %s2604_s19 }
 0x820   :  { %1367 = vrot.lane.b32.xlu0 %v1335_v14, %s2604_s19  ;;  %v2293_v15 = vpop.f32.mrb[26].mxu0 }
 0x821   :  { %v1266_v37 = vpop.f32.mrb[27].mxu0  ;;  %v1338_v38 = vmax.f32 %v2293_v15, 0.0 }
 0x822   :  { %v1337_v42 = vmax.f32 %v1266_v37, 0.0 }
 0x823   :  { %1417 = vrot.lane.b32.xlu1 %v1336_v39, %s2605_s20 }
 0x824   :  { %1415 = vrot.lane.b32.xlu0 %v1335_v14, %s2605_s20  ;;  %v2296_v46 = vpop.f32.mrb[28].mxu0 }
 0x825   :  { %v1276_v48 = vpop.f32.mrb[29].mxu0  ;;  %v1340_v56 = vmax.f32 %v2296_v46, 0.0 }
 0x826   :  { %v1339_v57 = vmax.f32 %v1276_v48, 0.0 }
 0x827   :  { %1373 = vrot.lane.b32.xlu1 %v1338_v38, %s2604_s19 }
 0x828   :  { %1371 = vrot.lane.b32.xlu0 %v1337_v42, %s2604_s19  ;;  %v2299_v21 = vpop.f32.mrb[30].mxu0 }
 0x829   :  { %v1286_v22 = vpop.f32.mrb[31].mxu0  ;;  %v1342_v30 = vmax.f32 %v2299_v21, 0.0 }
 0x82a   :  { %v1341_v1 = vmax.f32 %v1286_v22, 0.0 }
 0x82b   :  { %1421 = vrot.lane.b32.xlu1 %v1338_v38, %s2605_s20 }
 0x82c   :  { %1419 = vrot.lane.b32.xlu0 %v1337_v42, %s2605_s20  ;;  %v2302_v47 = vpop.f32.mrb[32].mxu0 }
 0x82d   :  { %v1296_v49 = vpop.f32.mrb[33].mxu0  ;;  %v1344_v44 = vmax.f32 %v2302_v47, 0.0 }
 0x82e   :  { %v1343_v45 = vmax.f32 %v1296_v49, 0.0 }
 0x82f   :  { %1377 = vrot.lane.b32.xlu1 %v1340_v56, %s2604_s19 }
 0x830   :  { %1375 = vrot.lane.b32.xlu0 %v1339_v57, %s2604_s19  ;;  %v2305_v60 = vpop.f32.mrb[34].mxu0 }
 0x831   :  { %v1306_v29 = vpop.f32.mrb[35].mxu0  ;;  %v1346_v35 = vmax.f32 %v2305_v60, 0.0 }
 0x832   :  { %v1345_v55 = vmax.f32 %v1306_v29, 0.0 }
 0x833   :  { %1425 = vrot.lane.b32.xlu1 %v1340_v56, %s2605_s20 }
 0x834   :  { %1423 = vrot.lane.b32.xlu0 %v1339_v57, %s2605_s20  ;;  %v2308_v2 = vpop.f32.mrb[36].mxu0 }
 0x835   :  { %v1316_v51 = vpop.f32.mrb[37].mxu0  ;;  %v1348_v10 = vmax.f32 %v2308_v2, 0.0 }
 0x836   :  { %v1347_v11 = vmax.f32 %v1316_v51, 0.0 }
 0x837   :  { %1381 = vrot.lane.b32.xlu1 %v1342_v30, %s2604_s19 }
 0x838   :  { %1379 = vrot.lane.b32.xlu0 %v1341_v1, %s2604_s19  ;;  %v2311_v52 = vpop.f32.mrb[38].mxu0 }
 0x839   :  { %v1326_v5 = vpop.f32.mrb[39].mxu0  ;;  %v1350_v12 = vmax.f32 %v2311_v52, 0.0 }
 0x83a   :  { %v1349_v58 = vmax.f32 %v1326_v5, 0.0 }
 0x83b   :  { %1429 = vrot.lane.b32.xlu1 %v1342_v30, %s2605_s20 }
 0x83c   :  { %1427 = vrot.lane.b32.xlu0 %v1341_v1, %s2605_s20 }
 0x83f   :  { %1385 = vrot.lane.b32.xlu1 %v1344_v44, %s2604_s19 }
 0x840   :  { %1383 = vrot.lane.b32.xlu0 %v1343_v45, %s2604_s19 }
 0x843   :  { %1433 = vrot.lane.b32.xlu1 %v1344_v44, %s2605_s20 }
 0x844   :  { %1431 = vrot.lane.b32.xlu0 %v1343_v45, %s2605_s20 }
 0x847   :  { %1389 = vrot.lane.b32.xlu1 %v1346_v35, %s2604_s19 }
 0x848   :  { %1387 = vrot.lane.b32.xlu0 %v1345_v55, %s2604_s19 }
 0x84b   :  { %1437 = vrot.lane.b32.xlu1 %v1346_v35, %s2605_s20 }
 0x84c   :  { %1435 = vrot.lane.b32.xlu0 %v1345_v55, %s2605_s20 }
 0x84f   :  { %1393 = vrot.lane.b32.xlu1 %v1348_v10, %s2604_s19 }
 0x850   :  { %1391 = vrot.lane.b32.xlu0 %v1347_v11, %s2604_s19 }
 0x853   :  { %1441 = vrot.lane.b32.xlu1 %v1348_v10, %s2605_s20 }
 0x854   :  { %1439 = vrot.lane.b32.xlu0 %v1347_v11, %s2605_s20 }
 0x857   :  { %1397 = vrot.lane.b32.xlu1 %v1350_v12, %s2604_s19 }
 0x858   :  { %1395 = vrot.lane.b32.xlu0 %v1349_v58, %s2604_s19 }
 0x85b   :  { %1445 = vrot.lane.b32.xlu1 %v1350_v12, %s2605_s20 }
 0x85c   :  { %1443 = vrot.lane.b32.xlu0 %v1349_v58, %s2605_s20 }
 0x891   :  { %v1370_v28 = vpop.permute.xlu1 %1369 }
 0x892   :  { %v1368_v16 = vpop.permute.xlu0 %1367 }
 0x895   :  { %v1418_v62 = vpop.permute.xlu1 %1417 }
 0x896   :  { %v1465_v0 = vsel %vm1463_vm3, %v1370_v28, %v1418_v62  ;;  %v1416_v3 = vpop.permute.xlu0 %1415 }
 0x897   :  { %v3081_v19 = vadd.f32 %v1465_v0, %v2969_v9  ;;  %v1464_v20 = vsel %vm1463_vm3, %v1368_v16, %v1416_v3 }
 0x898   :  { %v3085_v4 = vadd.f32 %v1464_v20, %v2973_v54 }
 0x899   :  { %v1374_v43 = vpop.permute.xlu1 %1373 }
 0x89a   :  { %v1372_v41 = vpop.permute.xlu0 %1371  ;;  %v2528_v23 = vpack.c.bf16 %v3081_v19, %v3085_v4 }
 0x89c   :  { %2529 = vmatprep.subr.bf16.mxu1 %v2528_v23 }
 0x89d   :  { %2531 = vmatpush3.bf16.msra.mxu1 %v2528_v23  ;;  %v1422_v7 = vpop.permute.xlu1 %1421 }
 0x89e   :  { %v1467_v8 = vsel %vm1463_vm3, %v1374_v43, %v1422_v7  ;;  %v1420_v26 = vpop.permute.xlu0 %1419 }
 0x89f   :  { %v3091_v27 = vadd.f32 %v1467_v8, %v2979_v17  ;;  %v1466_v9 = vsel %vm1463_vm3, %v1372_v41, %v1420_v26  ;;  %v1498_v8 = vld [vmem:[#allocation2 + $0x188] sm:$0xff]  ;;  %v1499_v26 = vld [vmem:[#allocation2 + $0x190] sm:$0xff] }
 0x8a0   :  { %v3095_v40 = vadd.f32 %v1466_v9, %v2983_v18  ;;  %v1500_v9 = vld [vmem:[#allocation2 + $0x198] sm:$0xff] }
 0x8a1   :  { %v1378_v54 = vpop.permute.xlu1 %1377 }
 0x8a2   :  { %v1376_v39 = vpop.permute.xlu0 %1375  ;;  %v2532_v31 = vpack.c.bf16 %v3091_v27, %v3095_v40 }
 0x8a4   :  { %2533 = vmatprep.subr.bf16.mxu1 %v2532_v31 }
 0x8a5   :  { %2535 = vmatpush3.bf16.msra.mxu1 %v2532_v31  ;;  %v1426_v14 = vpop.permute.xlu1 %1425  ;;  %v1504_v31 = vld [vmem:[#allocation2 + $0x1b8] sm:$0xff] }
 0x8a6   :  { %v1469_v15 = vsel %vm1463_vm3, %v1378_v54, %v1426_v14  ;;  %v1424_v37 = vpop.permute.xlu0 %1423  ;;  %v1501_v54 = vld [vmem:[#allocation2 + $0x1a0] sm:$0xff]  ;;  %v1506_v14 = vld [vmem:[#allocation2 + $0x1c8] sm:$0xff] }
 0x8a7   :  { %v3101_v38 = vadd.f32 %v1469_v15, %v2989_v24  ;;  %v1468_v17 = vsel %vm1463_vm3, %v1376_v39, %v1424_v37  ;;  %v1503_v39 = vld [vmem:[#allocation2 + $0x1b0] sm:$0xff]  ;;  %v1508_v37 = vld [vmem:[#allocation2 + $0x1d8] sm:$0xff] }
 0x8a8   :  { %v3105_v42 = vadd.f32 %v1468_v17, %v2993_v25  ;;  %v1507_v15 = vld [vmem:[#allocation2 + $0x1d0] sm:$0xff]  ;;  %v1509_v17 = vld [vmem:[#allocation2 + $0x1e0] sm:$0xff] }
 0x8a9   :  { %v1382_v18 = vpop.permute.xlu1 %1381 }
 0x8aa   :  { %v1380_v46 = vpop.permute.xlu0 %1379  ;;  %v2536_v48 = vpack.c.bf16 %v3101_v38, %v3105_v42 }
 0x8ac   :  { %2537 = vmatprep.subr.bf16.mxu1 %v2536_v48 }
 0x8ad   :  { %2539 = vmatpush3.bf16.msra.mxu1 %v2536_v48  ;;  %v1430_v21 = vpop.permute.xlu1 %1429  ;;  %v1512_v48 = vld [vmem:[#allocation2 + $0x1f8] sm:$0xff] }
 0x8ae   :  { %v1471_v22 = vsel %vm1463_vm3, %v1382_v18, %v1430_v21  ;;  %v1428_v56 = vpop.permute.xlu0 %1427  ;;  %v1510_v18 = vld [vmem:[#allocation2 + $0x1e8] sm:$0xff] }
 0x8af   :  { %v3111_v57 = vadd.f32 %v1471_v22, %v2999_v32  ;;  %v1470_v24 = vsel %vm1463_vm3, %v1380_v46, %v1428_v56  ;;  %v1511_v46 = vld [vmem:[#allocation2 + $0x1f0] sm:$0xff] }
 0x8b0   :  { %v3115_v47 = vadd.f32 %v1470_v24, %v3003_v36 }
 0x8b1   :  { %v1386_v25 = vpop.permute.xlu1 %1385 }
 0x8b2   :  { %v1384_v49 = vpop.permute.xlu0 %1383  ;;  %v2540_v60 = vpack.c.bf16 %v3111_v57, %v3115_v47 }
 0x8b4   :  { %2541 = vmatprep.subr.bf16.mxu1 %v2540_v60 }
 0x8b5   :  { %2543 = vmatpush3.bf16.msra.mxu1 %v2540_v60  ;;  %v1434_v29 = vpop.permute.xlu1 %1433 }
 0x8b6   :  { %v1473_v30 = vsel %vm1463_vm3, %v1386_v25, %v1434_v29  ;;  %v1432_v1 = vpop.permute.xlu0 %1431 }
 0x8b7   :  { %v3121_v2 = vadd.f32 %v1473_v30, %v3009_v50  ;;  %v1472_v32 = vsel %vm1463_vm3, %v1384_v49, %v1432_v1 }
 0x8b8   :  { %v3125_v51 = vadd.f32 %v1472_v32, %v3013_v53 }
 0x8b9   :  { %v1390_v36 = vpop.permute.xlu1 %1389 }
 0x8ba   :  { %v1388_v52 = vpop.permute.xlu0 %1387  ;;  %v2544_v5 = vpack.c.bf16 %v3121_v2, %v3125_v51 }
 0x8bc   :  { %2545 = vmatprep.subr.bf16.mxu1 %v2544_v5 }
 0x8bd   :  { %2547 = vmatpush3.bf16.msra.mxu1 %v2544_v5  ;;  %v1438_v44 = vpop.permute.xlu1 %1437 }
 0x8be   :  { %v1475_v45 = vsel %vm1463_vm3, %v1390_v36, %v1438_v44  ;;  %v1436_v35 = vpop.permute.xlu0 %1435 }
 0x8bf   :  { %v3131_v55 = vadd.f32 %v1475_v45, %v3019_v61  ;;  %v1474_v50 = vsel %vm1463_vm3, %v1388_v52, %v1436_v35 }
 0x8c0   :  { %v3135_v10 = vadd.f32 %v1474_v50, %v3023_v63 }
 0x8c1   :  { %v1394_v53 = vpop.permute.xlu1 %1393 }
 0x8c2   :  { %v1392_v11 = vpop.permute.xlu0 %1391  ;;  %v2548_v12 = vpack.c.bf16 %v3131_v55, %v3135_v10 }
 0x8c4   :  { %2549 = vmatprep.subr.bf16.mxu1 %v2548_v12 }
 0x8c5   :  { %2551 = vmatpush3.bf16.msra.mxu1 %v2548_v12  ;;  %v1442_v58 = vpop.permute.xlu1 %1441 }
 0x8c6   :  { %v1477_v59 = vsel %vm1463_vm3, %v1394_v53, %v1442_v58  ;;  %v1440_v28 = vpop.permute.xlu0 %1439 }
 0x8c7   :  { %v3141_v16 = vadd.f32 %v1477_v59, %v3029_v6  ;;  %v1476_v61 = vsel %vm1463_vm3, %v1392_v11, %v1440_v28 }
 0x8c8   :  { %v3145_v62 = vadd.f32 %v1476_v61, %v3033_v33 }
 0x8c9   :  { %v1398_v63 = vpop.permute.xlu1 %1397 }
 0x8ca   :  { %v1396_v0 = vpop.permute.xlu0 %1395  ;;  %v2552_v3 = vpack.c.bf16 %v3141_v16, %v3145_v62 }
 0x8cc   :  { %2553 = vmatprep.subr.bf16.mxu1 %v2552_v3 }
 0x8cd   :  { %2555 = vmatpush3.bf16.msra.mxu1 %v2552_v3  ;;  %v1446_v20 = vpop.permute.xlu1 %1445 }
 0x8ce   :  { %v1479_v43 = vsel %vm1463_vm3, %v1398_v63, %v1446_v20  ;;  %v1444_v41 = vpop.permute.xlu0 %1443 }
 0x8cf   :  { %v3151_v23 = vadd.f32 %v1479_v43, %v3039_v13  ;;  %v1478_v6 = vsel %vm1463_vm3, %v1396_v0, %v1444_v41  ;;  %v1502_v13 = vld [vmem:[#allocation2 + $0x1a8] sm:$0xff] }
 0x8d0   :  { %v3155_v7 = vadd.f32 %v1478_v6, %v3043_v34  ;;  %v1505_v34 = vld [vmem:[#allocation2 + $0x1c0] sm:$0xff] }
 0x8d2   :  { %v2556_v33 = vpack.c.bf16 %v3151_v23, %v3155_v7 }
 0x8d4   :  { %2557 = vmatprep.subr.bf16.mxu1 %v2556_v33 }
 0x8d5   :  { %2559 = vmatpush3.bf16.msra.mxu1 %v2556_v33 }
 0x8d8   :  { %2345 = vmatmul.mubr.f32.vlgmr.msra.gmra.mrb[24].mxu1 %v1498_v8 }
 0x8d9   :  { %2347 = vmatprep.mubr.f32.mxu1 %v1499_v26 }
 0x8dc   :  { %2348 = vmatmul.mubr.f32.gmra.mrb[26].mxu1 %v1500_v9 }
 0x8dd   :  { %2350 = vmatprep.mubr.f32.mxu1 %v1501_v54 }
 0x8e0   :  { %2351 = vmatmul.mubr.f32.gmra.mrb[28].mxu1 %v1502_v13 }
 0x8e1   :  { %2353 = vmatprep.mubr.f32.mxu1 %v1503_v39 }
 0x8e4   :  { %2354 = vmatmul.mubr.f32.gmra.mrb[30].mxu1 %v1504_v31 }
 0x8e5   :  { %2356 = vmatprep.mubr.f32.mxu1 %v1505_v34 }
 0x8e8   :  { %2357 = vmatmul.mubr.f32.gmra.mrb[32].mxu1 %v1506_v14 }
 0x8e9   :  { %2359 = vmatprep.mubr.f32.mxu1 %v1507_v15 }
 0x8ec   :  { %2360 = vmatmul.mubr.f32.gmra.mrb[34].mxu1 %v1508_v37 }
 0x8ed   :  { %2362 = vmatprep.mubr.f32.mxu1 %v1509_v17 }
 0x8f0   :  { %2363 = vmatmul.mubr.f32.gmra.mrb[36].mxu1 %v1510_v18 }
 0x8f1   :  { %2365 = vmatprep.mubr.f32.mxu1 %v1511_v46 }
 0x8f4   :  { %2366 = vmatmul.mubr.f32.gmra.mrb[38].mxu1 %v1512_v48 }
 0x9ab   :  { %v2346_v21 = vpop.f32.mrb[24].mxu1 }
 0x9ac   :  { %v1659_v22 = vmax.f32 %v2346_v21, 0.0  ;;  %v1579_v56 = vpop.f32.mrb[25].mxu1 }
 0x9ad   :  { %v1658_v24 = vmax.f32 %v1579_v56, 0.0 }
 0x9ae   :  { %1692 = vrot.lane.b32.xlu1 %v1659_v22, %s2603_s18 }
 0x9af   :  { %1690 = vrot.lane.b32.xlu0 %v1658_v24, %s2603_s18  ;;  %v2349_v25 = vpop.f32.mrb[26].mxu1 }
 0x9b0   :  { %v1589_v49 = vpop.f32.mrb[27].mxu1  ;;  %v1661_v60 = vmax.f32 %v2349_v25, 0.0 }
 0x9b1   :  { %v1660_v29 = vmax.f32 %v1589_v49, 0.0 }
 0x9b2   :  { %1740 = vrot.lane.b32.xlu1 %v1659_v22, %s2597_s23 }
 0x9b3   :  { %1738 = vrot.lane.b32.xlu0 %v1658_v24, %s2597_s23  ;;  %v2352_v30 = vpop.f32.mrb[28].mxu1 }
 0x9b4   :  { %v1599_v1 = vpop.f32.mrb[29].mxu1  ;;  %v1663_v52 = vmax.f32 %v2352_v30, 0.0 }
 0x9b5   :  { %v1662_v5 = vmax.f32 %v1599_v1, 0.0 }
 0x9b6   :  { %1696 = vrot.lane.b32.xlu1 %v1661_v60, %s2603_s18 }
 0x9b7   :  { %1694 = vrot.lane.b32.xlu0 %v1660_v29, %s2603_s18  ;;  %v2355_v32 = vpop.f32.mrb[30].mxu1 }
 0x9b8   :  { %v1609_v36 = vpop.f32.mrb[31].mxu1  ;;  %v1665_v53 = vmax.f32 %v2355_v32, 0.0 }
 0x9b9   :  { %v1664_v11 = vmax.f32 %v1609_v36, 0.0 }
 0x9ba   :  { %1744 = vrot.lane.b32.xlu1 %v1661_v60, %s2597_s23 }
 0x9bb   :  { %1742 = vrot.lane.b32.xlu0 %v1660_v29, %s2597_s23  ;;  %v2358_v44 = vpop.f32.mrb[32].mxu1 }
 0x9bc   :  { %v1619_v45 = vpop.f32.mrb[33].mxu1  ;;  %v1667_v61 = vmax.f32 %v2358_v44, 0.0 }
 0x9bd   :  { %v1666_v63 = vmax.f32 %v1619_v45, 0.0 }
 0x9be   :  { %1700 = vrot.lane.b32.xlu1 %v1663_v52, %s2603_s18 }
 0x9bf   :  { %1698 = vrot.lane.b32.xlu0 %v1662_v5, %s2603_s18  ;;  %v2361_v35 = vpop.f32.mrb[34].mxu1 }
 0x9c0   :  { %v1629_v50 = vpop.f32.mrb[35].mxu1  ;;  %v1669_v0 = vmax.f32 %v2361_v35, 0.0 }
 0x9c1   :  { %v1668_v3 = vmax.f32 %v1629_v50, 0.0 }
 0x9c2   :  { %1748 = vrot.lane.b32.xlu1 %v1663_v52, %s2597_s23 }
 0x9c3   :  { %1746 = vrot.lane.b32.xlu0 %v1662_v5, %s2597_s23  ;;  %v2364_v12 = vpop.f32.mrb[36].mxu1 }
 0x9c4   :  { %v1639_v58 = vpop.f32.mrb[37].mxu1  ;;  %v1671_v20 = vmax.f32 %v2364_v12, 0.0 }
 0x9c5   :  { %v1670_v43 = vmax.f32 %v1639_v58, 0.0 }
 0x9c6   :  { %1704 = vrot.lane.b32.xlu1 %v1665_v53, %s2603_s18 }
 0x9c7   :  { %1702 = vrot.lane.b32.xlu0 %v1664_v11, %s2603_s18  ;;  %v2367_v59 = vpop.f32.mrb[38].mxu1 }
 0x9c8   :  { %v1649_v28 = vpop.f32.mrb[39].mxu1  ;;  %v1673_v41 = vmax.f32 %v2367_v59, 0.0 }
 0x9c9   :  { %v1672_v6 = vmax.f32 %v1649_v28, 0.0 }
 0x9ca   :  { %1752 = vrot.lane.b32.xlu1 %v1665_v53, %s2597_s23 }
 0x9cb   :  { %1750 = vrot.lane.b32.xlu0 %v1664_v11, %s2597_s23 }
 0x9ce   :  { %1708 = vrot.lane.b32.xlu1 %v1667_v61, %s2603_s18 }
 0x9cf   :  { %1706 = vrot.lane.b32.xlu0 %v1666_v63, %s2603_s18 }
 0x9d2   :  { %1756 = vrot.lane.b32.xlu1 %v1667_v61, %s2597_s23 }
 0x9d3   :  { %1754 = vrot.lane.b32.xlu0 %v1666_v63, %s2597_s23 }
 0x9d6   :  { %1712 = vrot.lane.b32.xlu1 %v1669_v0, %s2603_s18 }
 0x9d7   :  { %1710 = vrot.lane.b32.xlu0 %v1668_v3, %s2603_s18 }
 0x9da   :  { %1760 = vrot.lane.b32.xlu1 %v1669_v0, %s2597_s23 }
 0x9db   :  { %1758 = vrot.lane.b32.xlu0 %v1668_v3, %s2597_s23 }
 0x9de   :  { %1716 = vrot.lane.b32.xlu1 %v1671_v20, %s2603_s18 }
 0x9df   :  { %1714 = vrot.lane.b32.xlu0 %v1670_v43, %s2603_s18 }
 0x9e2   :  { %1764 = vrot.lane.b32.xlu1 %v1671_v20, %s2597_s23 }
 0x9e3   :  { %1762 = vrot.lane.b32.xlu0 %v1670_v43, %s2597_s23 }
 0x9e6   :  { %1720 = vrot.lane.b32.xlu1 %v1673_v41, %s2603_s18 }
 0x9e7   :  { %1718 = vrot.lane.b32.xlu0 %v1672_v6, %s2603_s18 }
 0x9ea   :  { %1768 = vrot.lane.b32.xlu1 %v1673_v41, %s2597_s23 }
 0x9eb   :  { %1766 = vrot.lane.b32.xlu0 %v1672_v6, %s2597_s23 }
 0xa20   :  { %v1693_v33 = vpop.permute.xlu1 %1692 }
 0xa21   :  { %v1691_v8 = vpop.permute.xlu0 %1690 }
 0xa24   :  { %v1741_v26 = vpop.permute.xlu1 %1740 }
 0xa25   :  { %v1787_v9 = vsel %vm1140_vm2, %v1693_v33, %v1741_v26  ;;  %v1739_v54 = vpop.permute.xlu0 %1738 }
 0xa26   :  { %v1803_v13 = vadd.f32 %v1787_v9, %v3081_v19  ;;  %v1786_v39 = vsel %vm1140_vm2, %v1691_v8, %v1739_v54 }
 0xa27   :  { %v1802_v31 = vadd.f32 %v1786_v39, %v3085_v4 }
 0xa28   :  { %1820 = vst.msk [vmem:[%s3290_s3 + $0x8] sm:$0xff] %vm1818_vm4, %v1803_v13  ;;  %v1697_v34 = vpop.permute.xlu1 %1696 }
 0xa29   :  { %1819 = vst.msk [vmem:[%s3290_s3] sm:$0xff] %vm1818_vm4, %v1802_v31  ;;  %v1695_v14 = vpop.permute.xlu0 %1694 }
 0xa2c   :  { %v1745_v15 = vpop.permute.xlu1 %1744 }
 0xa2d   :  { %v1789_v37 = vsel %vm1140_vm2, %v1697_v34, %v1745_v15  ;;  %v1743_v19 = vpop.permute.xlu0 %1742 }
 0xa2e   :  { %v1805_v17 = vadd.f32 %v1789_v37, %v3091_v27  ;;  %v1788_v4 = vsel %vm1140_vm2, %v1695_v14, %v1743_v19 }
 0xa2f   :  { %v1804_v18 = vadd.f32 %v1788_v4, %v3095_v40 }
 0xa30   :  { %1822 = vst.msk [vmem:[%s3290_s3 + $0x18] sm:$0xff] %vm1818_vm4, %v1805_v17  ;;  %v1701_v46 = vpop.permute.xlu1 %1700 }
 0xa31   :  { %1821 = vst.msk [vmem:[%s3290_s3 + $0x10] sm:$0xff] %vm1818_vm4, %v1804_v18  ;;  %v1699_v48 = vpop.permute.xlu0 %1698 }
 0xa34   :  { %v1749_v21 = vpop.permute.xlu1 %1748 }
 0xa35   :  { %v1791_v22 = vsel %vm1140_vm2, %v1701_v46, %v1749_v21  ;;  %v1747_v27 = vpop.permute.xlu0 %1746 }
 0xa36   :  { %v1807_v56 = vadd.f32 %v1791_v22, %v3101_v38  ;;  %v1790_v40 = vsel %vm1140_vm2, %v1699_v48, %v1747_v27 }
 0xa37   :  { %v1806_v24 = vadd.f32 %v1790_v40, %v3105_v42 }
 0xa38   :  { %1824 = vst.msk [vmem:[%s3290_s3 + $0x28] sm:$0xff] %vm1818_vm4, %v1807_v56  ;;  %v1705_v25 = vpop.permute.xlu1 %1704 }
 0xa39   :  { %1823 = vst.msk [vmem:[%s3290_s3 + $0x20] sm:$0xff] %vm1818_vm4, %v1806_v24  ;;  %v1703_v49 = vpop.permute.xlu0 %1702 }
 0xa3c   :  { %v1753_v60 = vpop.permute.xlu1 %1752 }
 0xa3d   :  { %v1793_v29 = vsel %vm1140_vm2, %v1705_v25, %v1753_v60  ;;  %v1751_v38 = vpop.permute.xlu0 %1750 }
 0xa3e   :  { %v1809_v30 = vadd.f32 %v1793_v29, %v3111_v57  ;;  %v1792_v42 = vsel %vm1140_vm2, %v1703_v49, %v1751_v38 }
 0xa3f   :  { %v1808_v1 = vadd.f32 %v1792_v42, %v3115_v47 }
 0xa40   :  { %1826 = vst.msk [vmem:[%s3290_s3 + $0x38] sm:$0xff] %vm1818_vm4, %v1809_v30  ;;  %v1709_v32 = vpop.permute.xlu1 %1708 }
 0xa41   :  { %1825 = vst.msk [vmem:[%s3290_s3 + $0x30] sm:$0xff] %vm1818_vm4, %v1808_v1  ;;  %v1707_v36 = vpop.permute.xlu0 %1706 }
 0xa44   :  { %v1757_v52 = vpop.permute.xlu1 %1756 }
 0xa45   :  { %v1795_v5 = vsel %vm1140_vm2, %v1709_v32, %v1757_v52  ;;  %v1755_v57 = vpop.permute.xlu0 %1754 }
 0xa46   :  { %v1811_v44 = vadd.f32 %v1795_v5, %v3121_v2  ;;  %v1794_v47 = vsel %vm1140_vm2, %v1707_v36, %v1755_v57 }
 0xa47   :  { %v1810_v45 = vadd.f32 %v1794_v47, %v3125_v51 }
 0xa48   :  { %1828 = vst.msk [vmem:[%s3290_s3 + $0x48] sm:$0xff] %vm1818_vm4, %v1811_v44  ;;  %v1713_v35 = vpop.permute.xlu1 %1712 }
 0xa49   :  { %1827 = vst.msk [vmem:[%s3290_s3 + $0x40] sm:$0xff] %vm1818_vm4, %v1810_v45  ;;  %v1711_v50 = vpop.permute.xlu0 %1710 }
 0xa4c   :  { %v1761_v53 = vpop.permute.xlu1 %1760 }
 0xa4d   :  { %v1797_v11 = vsel %vm1140_vm2, %v1713_v35, %v1761_v53  ;;  %v1759_v2 = vpop.permute.xlu0 %1758 }
 0xa4e   :  { %v1813_v12 = vadd.f32 %v1797_v11, %v3131_v55  ;;  %v1796_v51 = vsel %vm1140_vm2, %v1711_v50, %v1759_v2 }
 0xa4f   :  { %v1812_v58 = vadd.f32 %v1796_v51, %v3135_v10 }
 0xa50   :  { %1830 = vst.msk [vmem:[%s3290_s3 + $0x58] sm:$0xff] %vm1818_vm4, %v1813_v12  ;;  %v1717_v59 = vpop.permute.xlu1 %1716 }
 0xa51   :  { %1829 = vst.msk [vmem:[%s3290_s3 + $0x50] sm:$0xff] %vm1818_vm4, %v1812_v58  ;;  %v1715_v28 = vpop.permute.xlu0 %1714 }
 0xa54   :  { %v1765_v61 = vpop.permute.xlu1 %1764 }
 0xa55   :  { %v1799_v63 = vsel %vm1140_vm2, %v1717_v59, %v1765_v61  ;;  %v1763_v55 = vpop.permute.xlu0 %1762 }
 0xa56   :  { %v1815_v0 = vadd.f32 %v1799_v63, %v3141_v16  ;;  %v1798_v10 = vsel %vm1140_vm2, %v1715_v28, %v1763_v55 }
 0xa57   :  { %v1814_v3 = vadd.f32 %v1798_v10, %v3145_v62 }
 0xa58   :  { %1832 = vst.msk [vmem:[%s3290_s3 + $0x68] sm:$0xff] %vm1818_vm4, %v1815_v0  ;;  %v1721_v20 = vpop.permute.xlu1 %1720 }
 0xa59   :  { %1831 = vst.msk [vmem:[%s3290_s3 + $0x60] sm:$0xff] %vm1818_vm4, %v1814_v3  ;;  %v1719_v43 = vpop.permute.xlu0 %1718 }
 0xa5c   :  { %v1769_v41 = vpop.permute.xlu1 %1768 }
 0xa5d   :  { %v1801_v6 = vsel %vm1140_vm2, %v1721_v20, %v1769_v41  ;;  %v1767_v16 = vpop.permute.xlu0 %1766 }
 0xa5e   :  { %v1817_v33 = vadd.f32 %v1801_v6, %v3151_v23  ;;  %v1800_v62 = vsel %vm1140_vm2, %v1719_v43, %v1767_v16 }
 0xa5f   :  { %v1816_v8 = vadd.f32 %v1800_v62, %v3155_v7 }
 0xa60   :  { %1834 = vst.msk [vmem:[%s3290_s3 + $0x78] sm:$0xff] %vm1818_vm4, %v1817_v33 }
 0xa61   :  { %1833 = vst.msk [vmem:[%s3290_s3 + $0x70] sm:$0xff] %vm1818_vm4, %v1816_v8 }
 0xa62   :  { %1839 = vsyncpa [#allocation3], 1 }

</bundles_post_ra>
